<compile_context>
chip_gen: v7x
topology: tpu7x:2x2x1
jax: 0.10.0
libtpu: 0.0.40
codegen_flags: <defaults>
</compile_context>

<pallas_src>
import math
import functools

import jax
import jax.numpy as jnp
from jax import lax
from jax.experimental import pallas as pl
from jax.experimental.pallas import tpu as pltpu


def _round_up(x: int, m: int) -> int:
    return (x + m - 1) // m * m


def _pos_encoder_kernel(cmin_ref, inv_ref, coords_ref, enc_ref, out_ref, *,
                        input_dim: int, n_coord_dims: int):
    coords = coords_ref[...]                                    # [tile_n, D] f32
    tile_n = coords.shape[0]

    # Normalize with globally precomputed per-column stats.  Reciprocal-multiply
    # instead of per-element division (matches the PyTorch forward up to 1 ulp).
    scaled = (coords - cmin_ref[...]) * inv_ref[...] * jnp.float32(input_dim)
    # .long() truncates toward zero; clamp to [0, input_dim-1] like torch.clamp.
    idx = jnp.clip(scaled.astype(jnp.int32), 0, input_dim - 1)  # [tile_n, D] int32

    # encoding[idx] followed by sum over dim=1  ==  counts @ encoding.
    # One-hot counts built in one fused compare + sublane (axis=1) reduction:
    # D lives on sublanes, input_dim on lanes.
    iota = lax.broadcasted_iota(jnp.int32, (tile_n, n_coord_dims, input_dim), 2)
    counts = jnp.sum((idx[:, :, None] == iota).astype(jnp.float32), axis=1)

    out_ref[...] = jnp.dot(counts, enc_ref[...],
                           preferred_element_type=jnp.float32)  # [tile_n, out_pad]


def make_encoding(input_dim: int, output_dim: int) -> jnp.ndarray:
    """Deterministic sinusoidal table, identical to PositionalEncoder.create_encoding."""
    pos = jnp.arange(input_dim, dtype=jnp.float32)[:, None]                  # [input_dim, 1]
    div_term = jnp.exp(jnp.arange(0, output_dim, 2, dtype=jnp.float32)
                       * (-math.log(10000.0) / output_dim))                  # [output_dim/2]
    enc = jnp.zeros((input_dim, output_dim), jnp.float32)
    enc = enc.at[:, 0::2].set(jnp.sin(pos * div_term))
    enc = enc.at[:, 1::2].set(jnp.cos(pos * div_term))
    return enc


def positional_encoder_forward(coordinates: jnp.ndarray, encoding: jnp.ndarray,
                               *, tile_n: int = 512) -> jnp.ndarray:
    n, d = coordinates.shape
    input_dim, output_dim = encoding.shape

    # Lane-dense output: pad embedding width to a multiple of 128 (unmasked stores).
    out_pad = max(128, _round_up(output_dim, 128))
    # Tile rows: multiple of 8 sublanes, no larger than the (padded) row count.
    tile_n = max(8, min(_round_up(tile_n, 8), _round_up(n, 8)))
    n_pad = _round_up(n, tile_n)
    grid_n = n_pad // tile_n

    coords = coordinates.astype(jnp.float32)

    # Global (all-N) per-column normalization stats, hoisted out of the kernel so
    # tiling over N stays numerically identical to the un-tiled reference.
    cmin = jnp.min(coords, axis=0, keepdims=True)               # [1, D]
    cmax = jnp.max(coords - cmin, axis=0, keepdims=True)        # [1, D]
    # One reciprocal per column.  NOTE: cmax == 0 (constant column) yields inf/NaN,
    # mirroring the PyTorch original's behaviour.
    inv = 1.0 / cmax                                            # [1, D]

    coords_p = jnp.pad(coords, ((0, n_pad - n), (0, 0)))                         # [n_pad, D]
    enc_p = jnp.pad(encoding.astype(jnp.float32),
                    ((0, 0), (0, out_pad - output_dim)))                         # [input_dim, out_pad]

    kernel = functools.partial(_pos_encoder_kernel,
                               input_dim=input_dim, n_coord_dims=d)

    cost = pl.CostEstimate(
        flops=2 * n_pad * input_dim * out_pad,
        transcendentals=0,
        bytes_accessed=4 * (n_pad * d + input_dim * out_pad + n_pad * out_pad + 2 * d),
    )

    out = pl.pallas_call(
        kernel,
        out_shape=jax.ShapeDtypeStruct((n_pad, out_pad), jnp.float32),
        grid=(grid_n,),
        in_specs=[
            pl.BlockSpec((1, d), lambda i: (0, 0)),                 # cmin   (resident)
            pl.BlockSpec((1, d), lambda i: (0, 0)),                 # 1/cmax (resident)
            pl.BlockSpec((tile_n, d), lambda i: (i, 0)),            # coords tile (pipelined)
            pl.BlockSpec((input_dim, out_pad), lambda i: (0, 0)),   # encoding table (resident)
        ],
        out_specs=pl.BlockSpec((tile_n, out_pad), lambda i: (i, 0)),
        compiler_params=pltpu.CompilerParams(
            dimension_semantics=("parallel",),          # 2 TCs on v7x share the N axis
            vmem_limit_bytes=32 * 1024 * 1024,          # safe on v5e/v6e/v7x; tiles are ~MiB
        ),
        cost_estimate=cost,
    )(cmin, inv, coords_p, enc_p)

    return out[:n, :output_dim]


def _reference_forward(coordinates, encoding):
    """Pure-JAX reference reproducing the PyTorch forward (reciprocal-multiply path,
    bit-identical to the kernel's index computation)."""
    input_dim = encoding.shape[0]
    c = coordinates - jnp.min(coordinates, axis=0)
    inv = 1.0 / jnp.max(c, axis=0)
    idx = jnp.clip((c * inv * input_dim).astype(jnp.int32), 0, input_dim - 1)
    return jnp.sum(encoding[idx], axis=1)


if __name__ == "__main__":
    INPUT_DIM = 16    # rows of the sinusoidal table
    OUTPUT_DIM = 32   # embedding width (even, as the PyTorch init requires)
    N = 400           # number of points
    D = 4             # coordinate dims per point

    key = jax.random.PRNGKey(0)
    coordinates = jax.random.uniform(key, (N, D), dtype=jnp.float32,
                                     minval=-3.0, maxval=5.0)
    encoding = make_encoding(INPUT_DIM, OUTPUT_DIM)

    # tile_n=128 -> padded N=512, grid=(4,): exercises the pipelined N tiling.
    out = positional_encoder_forward(coordinates, encoding, tile_n=128)
    out = jax.block_until_ready(out)

    ref = _reference_forward(coordinates, encoding)
    assert out.shape == (N, OUTPUT_DIM)
    assert jnp.allclose(out, ref, atol=1e-5, rtol=1e-5), "mismatch vs reference"

    print("KERNEL_OK")
</pallas_src>

<mosaic_0001>
module attributes {stable_mosaic.version = 11 : i64} {
  func.func @_pos_encoder_kernel(%arg0: i32, %arg1: memref<1x4xf32, #tpu.memory_space<vmem>>, %arg2: memref<1x4xf32, #tpu.memory_space<vmem>>, %arg3: memref<128x4xf32, #tpu.memory_space<vmem>>, %arg4: memref<16x128xf32, #tpu.memory_space<vmem>>, %arg5: memref<128x128xf32, #tpu.memory_space<vmem>>) attributes {dimension_semantics = [#tpu.dimension_semantics<parallel>], iteration_bounds = array<i64: 4>, scalar_prefetch = 0 : i64, scratch_operands = 0 : i64, tpu.core_type = #tpu.core_type<tc>, window_params = [{pipeline_mode = #tpu.pipeline_mode<synchronous>, transform_indices = @transform_0, window_bounds = array<i64: 1, 4>}, {pipeline_mode = #tpu.pipeline_mode<synchronous>, transform_indices = @transform_1, window_bounds = array<i64: 1, 4>}, {transform_indices = @transform_2, window_bounds = array<i64: 128, 4>}, {pipeline_mode = #tpu.pipeline_mode<synchronous>, transform_indices = @transform_3, window_bounds = array<i64: 16, 128>}, {transform_indices = @transform_4, window_bounds = array<i64: 128, 128>}]} {
    %c0 = arith.constant 0 : index
    %c0_0 = arith.constant 0 : index
    %0 = vector.load %arg3[%c0, %c0_0] : memref<128x4xf32, #tpu.memory_space<vmem>>, vector<128x4xf32>
    %c0_1 = arith.constant 0 : index
    %c0_2 = arith.constant 0 : index
    %1 = vector.load %arg1[%c0_1, %c0_2] : memref<1x4xf32, #tpu.memory_space<vmem>>, vector<1x4xf32>
    %2 = vector.broadcast %1 : vector<1x4xf32> to vector<128x4xf32>
    %3 = arith.subf %0, %2 : vector<128x4xf32>
    %c0_3 = arith.constant 0 : index
    %c0_4 = arith.constant 0 : index
    %4 = vector.load %arg2[%c0_3, %c0_4] : memref<1x4xf32, #tpu.memory_space<vmem>>, vector<1x4xf32>
    %5 = vector.broadcast %4 : vector<1x4xf32> to vector<128x4xf32>
    %6 = arith.mulf %3, %5 : vector<128x4xf32>
    %cst = arith.constant 1.600000e+01 : f32
    %7 = vector.broadcast %cst : f32 to vector<128x4xf32>
    %8 = arith.mulf %6, %7 : vector<128x4xf32>
    %9 = arith.fptosi %8 : vector<128x4xf32> to vector<128x4xi32>
    %c0_i32 = arith.constant 0 : i32
    %c15_i32 = arith.constant 15 : i32
    %10 = vector.broadcast %c0_i32 : i32 to vector<128x4xi32>
    %11 = arith.maxsi %10, %9 : vector<128x4xi32>
    %12 = vector.broadcast %c15_i32 : i32 to vector<128x4xi32>
    %13 = arith.minsi %12, %11 : vector<128x4xi32>
    %14 = tpu.iota {dimensions = array<i32: 2>} : vector<128x4x16xi32>
    %15 = vector.shape_cast %13 : vector<128x4xi32> to vector<128x4x1xi32>
    %16 = vector.broadcast %15 : vector<128x4x1xi32> to vector<128x4x16xi32>
    %17 = arith.cmpi eq, %16, %14 : vector<128x4x16xi32>
    %18 = arith.extui %17 : vector<128x4x16xi1> to vector<128x4x16xi32>
    %19 = arith.sitofp %18 : vector<128x4x16xi32> to vector<128x4x16xf32>
    %cst_5 = arith.constant dense<0.000000e+00> : vector<128x16xf32>
    %20 = vector.multi_reduction <add>, %19, %cst_5 [1] : vector<128x4x16xf32> to vector<128x16xf32>
    %c0_6 = arith.constant 0 : index
    %c0_7 = arith.constant 0 : index
    %21 = vector.load %arg4[%c0_6, %c0_7] : memref<16x128xf32, #tpu.memory_space<vmem>>, vector<16x128xf32>
    %cst_8 = arith.constant dense<0.000000e+00> : vector<128x128xf32>
    %22 = tpu.matmul %20, %21, %cst_8 {dimension_numbers = #tpu.dot_dimension_numbers<[1], [0], [0], [1], [0, 0, 1, 1], [], []>} : vector<128x16xf32>, vector<16x128xf32>, vector<128x128xf32> -> vector<128x128xf32>
    %c0_9 = arith.constant 0 : index
    %c0_10 = arith.constant 0 : index
    %23 = vector.load %arg5[%c0_9, %c0_10] : memref<128x128xf32, #tpu.memory_space<vmem>>, vector<128x128xf32>
    tpu.vector_store %arg5[%c0_9, %c0_10], %22 {strides = array<i32>} : memref<128x128xf32, #tpu.memory_space<vmem>>, vector<128x128xf32>,
    return
  }
  func.func @transform_0(%arg0: i32) -> (i32, i32) {
    %c0_i32 = arith.constant 0 : i32
    %c0_i32_0 = arith.constant 0 : i32
    %c0_i32_1 = arith.constant 0 : i32
    return %c0_i32, %c0_i32_0 : i32, i32
  }
  func.func @transform_1(%arg0: i32) -> (i32, i32) {
    %c0_i32 = arith.constant 0 : i32
    %c0_i32_0 = arith.constant 0 : i32
    %c0_i32_1 = arith.constant 0 : i32
    return %c0_i32, %c0_i32_0 : i32, i32
  }
  func.func @transform_2(%arg0: i32) -> (i32, i32) {
    %c0_i32 = arith.constant 0 : i32
    %c0_i32_0 = arith.constant 0 : i32
    return %arg0, %c0_i32 : i32, i32
  }
  func.func @transform_3(%arg0: i32) -> (i32, i32) {
    %c0_i32 = arith.constant 0 : i32
    %c0_i32_0 = arith.constant 0 : i32
    %c0_i32_1 = arith.constant 0 : i32
    return %c0_i32, %c0_i32_0 : i32, i32
  }
  func.func @transform_4(%arg0: i32) -> (i32, i32) {
    %c0_i32 = arith.constant 0 : i32
    %c0_i32_0 = arith.constant 0 : i32
    return %arg0, %c0_i32 : i32, i32
  }
}

</mosaic_0001>

<bundles_post_ra>
// kernel: tpu_custom_call.1
= control target key start
LH: loop header
LB: loop body
LE: loop exit
PB: predicated region body
PF: predicated region fallthrough
CT: control target
= control target key end

     0   :  { %9 = vsyncpa [#allocation3], 0  ;;  %s5156_s0 = inlined_call_operand.vmem [shape: f32[1,4], index: 0, kind: input, shape index: {}]   ;;  %s5157_s1 = inlined_call_operand.vmem [shape: f32[1,4], index: 1, kind: input, shape index: {}]   ;;  %s5158_s2 = inlined_call_operand.vmem [shape: f32[512,4], index: 2, kind: input, shape index: {}]   ;;  %s5159_s3 = inlined_call_operand.vmem [shape: f32[16,128], index: 3, kind: input, shape index: {}]   ;;  %s5160_s4 = inlined_call_operand.hbm [shape: f32[512,128], index: 4, kind: output, shape index: {}]  }
   0x1   :  { %11 = vsyncpa [#allocation3 + $0x1], 0  ;;  %s3433_s15 = smov 0   ;;  %s3435_s16 = smov 0  }
   0x2   :  { %s3437_s17 = smov 0   ;;  %s3439_s18 = smov 0  }
   0x3 LB: > { %s3454_s19 = sadd.s32 4294967295, %s3402_s18   ;;  %s3055_s20 = sadd.s32 4294967294, %s3402_s18   ;;  %s3402_s18 = sphi %s3439_s18, %s5214_s18   ;;  %s3398_s17 = sphi %s3437_s17, %s5213_s17   ;;  %s3394_s16 = sphi %s3435_s16, %s5212_s16   ;;  %s3390_s15 = sphi %s3433_s15, %s5211_s15  }
   0x4   : > { %s3458_s21 = sadd.s32 1, %s3402_s18   ;;  %s113_s22 = sadd.s32 1, %s3398_s17 }
   0x5   : > { %s110_s23 = ssub.s32 %s3402_s18, %s3458_s21  ;;  %p123_p0 = scmp.ne.s32.totalorder %s3398_s17, %s3394_s16 }
   0x6   : > { %p111_p1 = scmp.eq.s32.totalorder %s110_s23, 0  ;;  %p124_p2 = scmp.eq.s32.totalorder %s3454_s19, 3 }
   0x7   : > { %p129_p3 = scmp.ne.s32.totalorder %s3394_s16, %s3390_s15  ;;  %p130_p4 = scmp.eq.s32.totalorder %s3055_s20, 3 }
   0x8   : > { %s3469_s24 = scalar_select %p111_p1, %s3398_s17, %s113_s22  }
   0x9   : > { %p3471_p5 = por %p124_p2, %p123_p0  ;;  %p3475_p6 = por %p130_p4, %p129_p3 }
   0xa   : > { %p3058_p7 = scmp.ge.s32.totalorder %s3402_s18, 1  ;;  %p166_p8 = scmp.lt.s32.totalorder %s3402_s18, 5 }
   0xc   : > { %p167_p9 = pnand %p3058_p7, %p166_p8 }
   0xe   : > { %170 = sbr.rel (%p167_p9) target bundleno = 722 (0x2d2), region = 36 }
  0x15   : > { %s3060_s27 = sshll.u32 %s3454_s19, 4  ;;  %v3485_v0 = vld [vmem:[%s5156_s0] ss:$0 sm:$0xff]  ;;  %v357_v11 = vlaneseq  ;;  %s189_s14 = sand.u32 1, %s3394_s16  }
  0x16   : > { %p193_p10 = scmp.lt.s32.totalorder %s3060_s27, 63  ;;  %v3495_v1 = vld [vmem:[%s5157_s1] ss:$0 sm:$0xff]  ;;  %s3059_s20 = sshll.u32 %s189_s14, 7 }
  0x17   : > { %v3510_v20 = vshrl.u32 %v357_v11, 7  ;;  %s5086_s22 = scalar_lea.vmem [#allocation2], %s3059_s20  ;;  %s3213_s23 = sshll.u32 %s3454_s19, 11 }
  0x18   : > { %s5216_s27 = smov (!%p193_p10, %s3060_s27), 63  ;;  %s5105_s30 = scalar_lea.hbm %s5160_s4, %s3213_s23 }
  0x19   : > { %s3061_s28 = sshll.u32 %s5216_s27, 3  ;;  %v3513_v27 = vsub.s32 0, %v3510_v20  ;;  %v3516_v31 = vsub.s32 1, %v3510_v20  ;;  %v3531_v39 = vsub.s32 2, %v3510_v20  ;;  %v3550_v51 = vsub.s32 3, %v3510_v20  ;;  %s2993_s27 = sshll.u32 %s5086_s22, 4  ;;  %s5107_s27 = int_to_ptr.vmem [resolvable:$true] %s2993_s27 }
  0x1a   : > { %s3490_s7 = scalar_lea.vmem %s5158_s2, %s3061_s28  ;;  %v3564_v61 = vsub.s32 4, %v3510_v20  ;;  %s5115_s19 = scalar_lea.sflag [#allocation3], %s189_s14 }
  0x1b   : > { %v207_v2 = vld [vmem:[%s3490_s7 + $0x40] sm:$0xff]  ;;  %v200_v4 = vld [vmem:[%s3490_s7 + $0x8] sm:$0xff]  ;;  %v201_v41 = vld [vmem:[%s3490_s7 + $0x10] sm:$0xff]  ;;  %s3340_s5 = scalar_lea.vmem %s5107_s27, 2048  ;;  %s3405_s6 = smov [#allocation2]  }
  0x1c   : > { %v199_v3 = vld [vmem:[%s3490_s7] sm:$0xff]  ;;  %v230_v5 = vsub.f32 %v207_v2, %v3485_v0  ;;  %v223_v7 = vsub.f32 %v200_v4, %v3485_v0  ;;  %v208_v8 = vld [vmem:[%s3490_s7 + $0x48] sm:$0xff]  ;;  %v224_v45 = vsub.f32 %v201_v41, %v3485_v0  ;;  %v209_v50 = vld [vmem:[%s3490_s7 + $0x50] sm:$0xff]  ;;  %v3607_v41 = vsub.s32 6, %v3510_v20  ;;  %p3341_p11 = scmp.ne.s32.totalorder %s5107_s27, %s3340_s5 }
  0x1d   : > { %v222_v6 = vsub.f32 %v199_v3, %v3485_v0  ;;  %v231_v9 = vsub.f32 %v208_v8, %v3485_v0  ;;  %v232_v55 = vsub.f32 %v209_v50, %v3485_v0  ;;  %v202_v60 = vld [vmem:[%s3490_s7 + $0x18] sm:$0xff] }
  0x1e   : > { %v253_v10 = vmul.f32 %v3495_v1, %v230_v5  ;;  %v246_v13 = vmul.f32 %v3495_v1, %v223_v7  ;;  %v247_v48 = vmul.f32 %v3495_v1, %v224_v45  ;;  %v225_v62 = vsub.f32 %v202_v60, %v3485_v0  ;;  %v203_v60 = vld [vmem:[%s3490_s7 + $0x20] sm:$0xff]  ;;  %p3342_p12 = pnand %p3341_p11, %p3471_p5 }
  0x1f   : > { %v245_v12 = vmul.f32 %v3495_v1, %v222_v6  ;;  %v254_v14 = vmul.f32 %v3495_v1, %v231_v9  ;;  %v255_v59 = vmul.f32 %v3495_v1, %v232_v55  ;;  %v3577_v9 = vsub.s32 5, %v3510_v20 }
  0x20   : > { %v269_v15 = vmul.f32 16.0, %v253_v10  ;;  %v262_v17 = vmul.f32 16.0, %v246_v13  ;;  %v263_v54 = vmul.f32 16.0, %v247_v48  ;;  %v248_v5 = vmul.f32 %v3495_v1, %v225_v62  ;;  %p3343_p13 = pneg %p3342_p12 }
  0x21   : > { %v261_v16 = vmul.f32 16.0, %v245_v12  ;;  %v270_v18 = vmul.f32 16.0, %v254_v14  ;;  %v271_v4 = vmul.f32 16.0, %v255_v59  ;;  %5167 = vst [vmem:[#allocation5_spill] sm:$0xff] %v3577_v9  ;;  %v3634_v59 = vsub.s32 7, %v3510_v20 }
  0x22   : > { %v3282_v19 = vtrunc.f32 %v269_v15  ;;  %v3268_v22 = vtrunc.f32 %v262_v17  ;;  %v3270_v58 = vtrunc.f32 %v263_v54  ;;  %v264_v15 = vmul.f32 16.0, %v248_v5 }
  0x23   : > { %v3266_v21 = vtrunc.f32 %v261_v16  ;;  %v3284_v26 = vtrunc.f32 %v270_v18  ;;  %v3286_v8 = vtrunc.f32 %v271_v4  ;;  %v210_v16 = vld [vmem:[%s3490_s7 + $0x58] sm:$0xff] }
  0x24   : > { %v3283_v23 = vcvt.f32.s32 %v3282_v19  ;;  %v3269_v25 = vcvt.f32.s32 %v3268_v22  ;;  %v3271_v3 = vcvt.f32.s32 %v3270_v58  ;;  %v233_v17 = vsub.f32 %v210_v16, %v3485_v0  ;;  %v205_v16 = vld [vmem:[%s3490_s7 + $0x30] sm:$0xff] }
  0x25   : > { %v3267_v24 = vcvt.f32.s32 %v3266_v21  ;;  %v3285_v32 = vcvt.f32.s32 %v3284_v26  ;;  %v3287_v14 = vcvt.f32.s32 %v3286_v8  ;;  %v3272_v21 = vtrunc.f32 %v264_v15  ;;  %v212_v8 = vld [vmem:[%s3490_s7 + $0x68] sm:$0xff] }
  0x26   : > { %vm309_vm0 = vcmp.gt.s32.totalorder %v3283_v23, 0  ;;  %vm295_vm2 = vcmp.gt.s32.totalorder %v3269_v25, 0  ;;  %vm297_vm8 = vcmp.gt.s32.totalorder %v3271_v3, 0  ;;  %v235_v15 = vsub.f32 %v212_v8, %v3485_v0 }
  0x27   : > { %vm293_vm1 = vcmp.gt.s32.totalorder %v3267_v24, 0  ;;  %v310_v28 = vsel %vm309_vm0, %v3283_v23, 0  ;;  %v296_v30 = vsel %vm295_vm2, %v3269_v25, 0  ;;  %vm311_vm6 = vcmp.gt.s32.totalorder %v3285_v32, 0 }
  0x28   : > { %v294_v29 = vsel %vm293_vm1, %v3267_v24, 0  ;;  %vm341_vm3 = vcmp.lt.s32.totalorder %v310_v28, 15  ;;  %vm327_vm5 = vcmp.lt.s32.totalorder %v296_v30, 15  ;;  %v312_v42 = vsel %vm311_vm6, %v3285_v32, 0 }
  0x29   : > { %vm325_vm4 = vcmp.lt.s32.totalorder %v294_v29, 15  ;;  %v3518_v33 = vsel %vm341_vm3, %v310_v28, 15  ;;  %v3533_v40 = vsel %vm327_vm5, %v296_v30, 15  ;;  %vm343_vm7 = vcmp.lt.s32.totalorder %v312_v42, 15 }
  0x2a   : > { %v3520_v34 = vsel %vm325_vm4, %v294_v29, 15  ;;  %v810_v35 = vrot.slane %v3518_v33, %v3513_v27  ;;  %v817_v37 = vrot.slane %v3518_v33, %v3516_v31  ;;  %v418_v43 = vrot.slane %v3533_v40, %v3513_v27 }
  0x2b   : > { %v362_v36 = vrot.slane %v3520_v34, %v3513_v27  ;;  %v369_v38 = vrot.slane %v3520_v34, %v3516_v31  ;;  %v376_v44 = vrot.slane %v3520_v34, %v3531_v39  ;;  %v824_v46 = vrot.slane %v3518_v33, %v3531_v39 }
  0x2c   : > { %812 = vbcast.lane.b32.xlu1 %v810_v35, 256  ;;  %v425_v47 = vrot.slane %v3533_v40, %v3516_v31  ;;  %v3546_v49 = vsel %vm343_vm7, %v312_v42, 15  ;;  %v432_v56 = vrot.slane %v3533_v40, %v3531_v39  ;;  %v383_v57 = vrot.slane %v3520_v34, %v3550_v51 }
  0x2d   : > { %364 = vbcast.lane.b32.xlu0 %v362_v36, 256  ;;  %v873_v52 = vrot.slane %v3546_v49, %v3516_v31  ;;  %v866_v53 = vrot.slane %v3546_v49, %v3513_v27  ;;  %v880_v63 = vrot.slane %v3546_v49, %v3531_v39  ;;  %v831_v2 = vrot.slane %v3518_v33, %v3550_v51 }
  0x2e   : > { %v439_v6 = vrot.slane %v3533_v40, %v3550_v51  ;;  %v390_v7 = vrot.slane %v3520_v34, %v3564_v61  ;;  %v298_v10 = vsel %vm297_vm8, %v3271_v3, 0  ;;  %v887_v12 = vrot.slane %v3546_v49, %v3550_v51  ;;  %v211_v3 = vld [vmem:[%s3490_s7 + $0x60] sm:$0xff] }
  0x2f   : > { %v838_v13 = vrot.slane %v3518_v33, %v3564_v61  ;;  %vm329_vm9 = vcmp.lt.s32.totalorder %v298_v10, 15  ;;  %v446_v18 = vrot.slane %v3533_v40, %v3564_v61  ;;  %v397_v19 = vrot.slane %v3520_v34, %v3577_v9 }
  0x30   : > { %819 = vbcast.lane.b32.xlu1 %v817_v37, 256  ;;  %vm313_vm10 = vcmp.gt.s32.totalorder %v3287_v14, 0  ;;  %v3589_v22 = vsel %vm329_vm9, %v298_v10, 15  ;;  %v3273_v26 = vcvt.f32.s32 %v3272_v21  ;;  %v256_v28 = vmul.f32 %v3495_v1, %v233_v17  ;;  %v213_v21 = vld [vmem:[%s3490_s7 + $0x70] sm:$0xff] }
  0x31   : > { %371 = vbcast.lane.b32.xlu0 %v369_v38, 256  ;;  %v314_v23 = vsel %vm313_vm10, %v3287_v14, 0  ;;  %v481_v24 = vrot.slane %v3589_v22, %v3516_v31  ;;  %v474_v25 = vrot.slane %v3589_v22, %v3513_v27  ;;  %v894_v29 = vrot.slane %v3546_v49, %v3564_v61 }
  0x32   : > { %vm345_vm11 = vcmp.lt.s32.totalorder %v314_v23, 15  ;;  %v845_v30 = vrot.slane %v3518_v33, %v3577_v9  ;;  %vm299_vm12 = vcmp.gt.s32.totalorder %v3273_v26, 0  ;;  %v272_v32 = vmul.f32 16.0, %v256_v28 }
  0x33   : > { %v3600_v35 = vsel %vm345_vm11, %v314_v23, 15  ;;  %v300_v36 = vsel %vm299_vm12, %v3273_v26, 0  ;;  %v488_v48 = vrot.slane %v3589_v22, %v3531_v39  ;;  %v901_v55 = vrot.slane %v3546_v49, %v3577_v9  ;;  %v206_v26 = vld [vmem:[%s3490_s7 + $0x38] sm:$0xff] }
  0x34   : > { %420 = vbcast.lane.b32.xlu1 %v418_v43, 256  ;;  %v929_v37 = vrot.slane %v3600_v35, %v3516_v31  ;;  %v922_v38 = vrot.slane %v3600_v35, %v3513_v27  ;;  %v3288_v42 = vtrunc.f32 %v272_v32  ;;  %vm331_vm13 = vcmp.lt.s32.totalorder %v300_v36, 15 }
  0x35   : > { %378 = vbcast.lane.b32.xlu0 %v376_v44, 256  ;;  %v453_v43 = vrot.slane %v3533_v40, %v3577_v9  ;;  %v404_v44 = vrot.slane %v3520_v34, %v3607_v41  ;;  %v936_v54 = vrot.slane %v3600_v35, %v3531_v39  ;;  %v460_v62 = vrot.slane %v3533_v40, %v3607_v41 }
  0x36   : > { %v3289_v45 = vcvt.f32.s32 %v3288_v42  ;;  %v495_v20 = vrot.slane %v3589_v22, %v3550_v51  ;;  %v859_v10 = vrot.slane %v3518_v33, %v3634_v59  ;;  %v228_v23 = vsub.f32 %v205_v16, %v3485_v0 }
  0x37   : > { %v236_v28 = vsub.f32 %v213_v21, %v3485_v0  ;;  %v957_v16 = vrot.slane %v3600_v35, %v3577_v9  ;;  %vm1639_vm11 = vcmask 125952  }
  0x38   : > { %826 = vbcast.lane.b32.xlu1 %v824_v46, 256  ;;  %v3613_v46 = vsel %vm331_vm13, %v300_v36, 15  ;;  %vm315_vm14 = vcmp.gt.s32.totalorder %v3289_v45, 0 }
  0x39   : > { %427 = vbcast.lane.b32.xlu0 %v425_v47, 256  ;;  %v530_v47 = vrot.slane %v3613_v46, %v3513_v27  ;;  %v316_v50 = vsel %vm315_vm14, %v3289_v45, 0  ;;  %v544_v4 = vrot.slane %v3613_v46, %v3531_v39  ;;  %v214_v45 = vld [vmem:[%s3490_s7 + $0x78] sm:$0xff] }
  0x3a   : > { %vm347_vm15 = vcmp.lt.s32.totalorder %v316_v50, 15 }
  0x3c   : > { %875 = vbcast.lane.b32.xlu1 %v873_v52, 256  ;;  %v852_v52 = vrot.slane %v3518_v33, %v3607_v41 }
  0x3d   : > { %868 = vbcast.lane.b32.xlu0 %v866_v53, 256  ;;  %v537_v53 = vrot.slane %v3613_v46, %v3516_v31 }
  0x40   : > { %434 = vbcast.lane.b32.xlu1 %v432_v56, 256  ;;  %v3627_v56 = vsel %vm347_vm15, %v316_v50, 15 }
  0x41   : > { %385 = vbcast.lane.b32.xlu0 %v383_v57, 256  ;;  %v985_v57 = vrot.slane %v3627_v56, %v3516_v31  ;;  %v978_v58 = vrot.slane %v3627_v56, %v3513_v27  ;;  %v992_v17 = vrot.slane %v3627_v56, %v3531_v39 }
  0x44   : > { %882 = vbcast.lane.b32.xlu1 %v880_v63, 256  ;;  %v411_v63 = vrot.slane %v3520_v34, %v3634_v59  ;;  %v908_v34 = vrot.slane %v3546_v49, %v3607_v41 }
  0x45   : > { %833 = vbcast.lane.b32.xlu0 %v831_v2, 256  ;;  %v226_v2 = vsub.f32 %v203_v60, %v3485_v0  ;;  %v999_v60 = vrot.slane %v3627_v56, %v3550_v51 }
  0x47   : > { %v249_v5 = vmul.f32 %v3495_v1, %v226_v2 }
  0x48   : > { %441 = vbcast.lane.b32.xlu1 %v439_v6, 256  ;;  %v204_v6 = vld [vmem:[%s3490_s7 + $0x28] sm:$0xff]  ;;  %s3344_s7 = sshll.u32 %s3405_s6, 4  ;;  %s3345_s7 = int_to_ptr.vmem [resolvable:$false] %s3344_s7 }
  0x49   : > { %392 = vbcast.lane.b32.xlu0 %v390_v7, 256  ;;  %v234_v7 = vsub.f32 %v211_v3, %v3485_v0  ;;  %s3346_s8 = scalar_lea.vmem %s3345_s7, 4096  ;;  %p3347_p0 = scmp.lt.s32.totalorder %s5107_s27, %s3345_s7 }
  0x4a   : > { %p3348_p1 = scmp.lt.s32.totalorder %s3346_s8, %s3340_s5 }
  0x4b   : > { %v257_v14 = vmul.f32 %v3495_v1, %v234_v7 }
  0x4c   : > { %889 = vbcast.lane.b32.xlu1 %v887_v12, 256  ;;  %v265_v12 = vmul.f32 16.0, %v249_v5  ;;  %v509_v5 = vrot.slane %v3589_v22, %v3577_v9  ;;  %p3349_p2 = por %p3348_p1, %p3347_p0 }
  0x4d   : > { %840 = vbcast.lane.b32.xlu0 %v838_v13, 256  ;;  %v227_v13 = vsub.f32 %v204_v6, %v3485_v0 }
  0x4e   : > { %p3350_p3 = pnand %p3349_p2, %p3343_p13 }
  0x4f   : > { %v250_v33 = vmul.f32 %v3495_v1, %v227_v13 }
  0x50   : > { %448 = vbcast.lane.b32.xlu1 %v446_v18, 256  ;;  %v943_v18 = vrot.slane %v3600_v35, %v3550_v51 }
  0x51   : > { %399 = vbcast.lane.b32.xlu0 %v397_v19, 256  ;;  %v3274_v19 = vtrunc.f32 %v265_v12  ;;  %v266_v36 = vmul.f32 16.0, %v250_v33  ;;  %v3695_v12 = vand.u32 127, %v357_v11  ;;  %v516_v33 = vrot.slane %v3589_v22, %v3607_v41 }
  0x53   : > { %v3275_v32 = vcvt.f32.s32 %v3274_v19  ;;  %v565_v19 = vrot.slane %v3613_v46, %v3577_v9 }
  0x54   : > { %483 = vbcast.lane.b32.xlu1 %v481_v24, 256  ;;  %v273_v24 = vmul.f32 16.0, %v257_v14 }
  0x55   : > { %476 = vbcast.lane.b32.xlu0 %v474_v25, 256  ;;  %v258_v25 = vmul.f32 %v3495_v1, %v235_v15  ;;  %vm301_vm0 = vcmp.gt.s32.totalorder %v3275_v32, 0 }
  0x56   : > { %v3290_v42 = vtrunc.f32 %v273_v24  ;;  %v964_v24 = vrot.slane %v3600_v35, %v3607_v41 }
  0x58   : > { %896 = vbcast.lane.b32.xlu1 %v894_v29, 256  ;;  %v502_v29 = vrot.slane %v3589_v22, %v3564_v61 }
  0x59   : > { %847 = vbcast.lane.b32.xlu0 %v845_v30, 256  ;;  %v467_v30 = vrot.slane %v3533_v40, %v3634_v59  ;;  %v3276_v40 = vtrunc.f32 %v266_v36  ;;  %v971_v36 = vrot.slane %v3600_v35, %v3634_v59 }
  0x5c   : > { %931 = vbcast.lane.b32.xlu1 %v929_v37, 256  ;;  %v251_v37 = vmul.f32 %v3495_v1, %v228_v23 }
  0x5d   : > { %924 = vbcast.lane.b32.xlu0 %v922_v38, 256  ;;  %v229_v38 = vsub.f32 %v206_v26, %v3485_v0  ;;  %v572_v26 = vrot.slane %v3613_v46, %v3607_v41 }
  0x5e   : > { %v267_v50 = vmul.f32 16.0, %v251_v37 }
  0x60   : > { %455 = vbcast.lane.b32.xlu1 %v453_v43, 256  ;;  %v274_v43 = vmul.f32 16.0, %v258_v25  ;;  %v1013_v25 = vrot.slane %v3627_v56, %v3577_v9 }
  0x61   : > { %406 = vbcast.lane.b32.xlu0 %v404_v44, 256  ;;  %v259_v44 = vmul.f32 %v3495_v1, %v236_v28  ;;  %v523_v28 = vrot.slane %v3589_v22, %v3634_v59 }
  0x64   : > { %532 = vbcast.lane.b32.xlu1 %v530_v47, 256  ;;  %v915_v47 = vrot.slane %v3546_v49, %v3634_v59  ;;  %v950_v49 = vrot.slane %v3600_v35, %v3564_v61 }
  0x65   : > { %490 = vbcast.lane.b32.xlu0 %v488_v48, 256  ;;  %v551_v48 = vrot.slane %v3613_v46, %v3550_v51 }
  0x68   : > { %854 = vbcast.lane.b32.xlu1 %v852_v52, 256  ;;  %v252_v52 = vmul.f32 %v3495_v1, %v229_v38 }
  0x69   : > { %539 = vbcast.lane.b32.xlu0 %v537_v53, 256  ;;  %v3291_v53 = vcvt.f32.s32 %v3290_v42 }
  0x6a   : > { %v268_v2 = vmul.f32 16.0, %v252_v52 }
  0x6b   : > { %vm317_vm2 = vcmp.gt.s32.totalorder %v3291_v53, 0 }
  0x6c   : > { %938 = vbcast.lane.b32.xlu1 %v936_v54, 256  ;;  %v3292_v54 = vtrunc.f32 %v274_v43  ;;  %v318_v7 = vsel %vm317_vm2, %v3291_v53, 0 }
  0x6d   : > { %903 = vbcast.lane.b32.xlu0 %v901_v55, 256  ;;  %v237_v55 = vsub.f32 %v214_v45, %v3485_v0  ;;  %v558_v0 = vrot.slane %v3613_v46, %v3564_v61  ;;  %vm349_vm5 = vcmp.lt.s32.totalorder %v318_v7, 15 }
  0x6e   : > { %v3293_v3 = vcvt.f32.s32 %v3292_v54  ;;  %v3709_v23 = vsel %vm349_vm5, %v318_v7, 15 }
  0x6f   : > { %v1041_v37 = vrot.slane %v3709_v23, %v3516_v31  ;;  %v1048_v45 = vrot.slane %v3709_v23, %v3531_v39  ;;  %v1055_v54 = vrot.slane %v3709_v23, %v3550_v51 }
  0x70   : > { %987 = vbcast.lane.b32.xlu1 %v985_v57, 256  ;;  %v302_v57 = vsel %vm301_vm0, %v3275_v32, 0  ;;  %vm319_vm4 = vcmp.gt.s32.totalorder %v3293_v3, 0  ;;  %v1020_v32 = vrot.slane %v3627_v56, %v3607_v41 }
  0x71   : > { %980 = vbcast.lane.b32.xlu0 %v978_v58, 256  ;;  %v275_v58 = vmul.f32 16.0, %v259_v44  ;;  %vm333_vm1 = vcmp.lt.s32.totalorder %v302_v57, 15  ;;  %v1034_v44 = vrot.slane %v3709_v23, %v3513_v27 }
  0x72   : > { %v3692_v6 = vsel %vm333_vm1, %v302_v57, 15 }
  0x73   : > { %v593_v14 = vrot.slane %v3692_v6, %v3516_v31  ;;  %v586_v15 = vrot.slane %v3692_v6, %v3513_v27  ;;  %v600_v38 = vrot.slane %v3692_v6, %v3531_v39  ;;  %v607_v53 = vrot.slane %v3692_v6, %v3550_v51 }
  0x74   : > { %462 = vbcast.lane.b32.xlu1 %v460_v62, 256  ;;  %v3277_v62 = vcvt.f32.s32 %v3276_v40 }
  0x75   : > { %413 = vbcast.lane.b32.xlu0 %v411_v63, 256  ;;  %v3278_v63 = vtrunc.f32 %v267_v50 }
  0x76   : > { %vm303_vm3 = vcmp.gt.s32.totalorder %v3277_v62, 0 }
  0x77   : > { %v3279_v8 = vcvt.f32.s32 %v3278_v63  ;;  %v1027_v63 = vrot.slane %v3627_v56, %v3634_v59 }
  0x78   : > { %546 = vbcast.lane.b32.xlu1 %v544_v4, 256  ;;  %v260_v4 = vmul.f32 %v3495_v1, %v237_v55  ;;  %v304_v1 = vsel %vm303_vm3, %v3277_v62, 0  ;;  %v614_v55 = vrot.slane %v3692_v6, %v3564_v61 }
  0x79   : > { %497 = vbcast.lane.b32.xlu0 %v495_v20, 256  ;;  %v3294_v20 = vtrunc.f32 %v275_v58  ;;  %vm305_vm6 = vcmp.gt.s32.totalorder %v3279_v8, 0  ;;  %vm335_vm7 = vcmp.lt.s32.totalorder %v304_v1, 15  ;;  %v579_v58 = vrot.slane %v3613_v46, %v3634_v59 }
  0x7b   : > { %v3295_v13 = vcvt.f32.s32 %v3294_v20 }
  0x7c   : > { %910 = vbcast.lane.b32.xlu1 %v908_v34, 256  ;;  %v3280_v34 = vtrunc.f32 %v268_v2 }
  0x7d   : > { %861 = vbcast.lane.b32.xlu0 %v859_v10, 256  ;;  %v276_v10 = vmul.f32 16.0, %v260_v4  ;;  %vm321_vm8 = vcmp.gt.s32.totalorder %v3295_v13, 0  ;;  %v1062_v4 = vrot.slane %v3709_v23, %v3564_v61 }
  0x7e   : > { %v3281_v11 = vcvt.f32.s32 %v3280_v34  ;;  %v322_v42 = vsel %vm321_vm8, %v3295_v13, 0 }
  0x7f   : > { %v3296_v21 = vtrunc.f32 %v276_v10  ;;  %vm353_vm13 = vcmp.lt.s32.totalorder %v322_v42, 15 }
  0x80   : > { %994 = vbcast.lane.b32.xlu1 %v992_v17, 256  ;;  %v1006_v17 = vrot.slane %v3627_v56, %v3564_v61  ;;  %vm307_vm10 = vcmp.gt.s32.totalorder %v3281_v11, 0  ;;  %v3765_v20 = vsel %vm353_vm13, %v322_v42, 15 }
  0x81   : > { %945 = vbcast.lane.b32.xlu0 %v943_v18, 256  ;;  %v320_v18 = vsel %vm319_vm4, %v3293_v3, 0  ;;  %v3297_v43 = vcvt.f32.s32 %v3296_v21  ;;  %v308_v52 = vsel %vm307_vm10, %v3281_v11, 0 }
  0x82   : > { %vm351_vm9 = vcmp.lt.s32.totalorder %v320_v18, 15  ;;  %vm339_vm15 = vcmp.lt.s32.totalorder %v308_v52, 15 }
  0x83   : > { %vm323_vm14 = vcmp.gt.s32.totalorder %v3297_v43, 0 }
  0x84   : > { %504 = vbcast.lane.b32.xlu1 %v502_v29, 256  ;;  %v306_v29 = vsel %vm305_vm6, %v3279_v8, 0  ;;  %v324_v8 = vsel %vm323_vm14, %v3297_v43, 0 }
  0x85   : > { %469 = vbcast.lane.b32.xlu0 %v467_v30, 256  ;;  %v3719_v30 = vsel %vm335_vm7, %v304_v1, 15  ;;  %vm337_vm12 = vcmp.lt.s32.totalorder %v306_v29, 15  ;;  %vm355_vm2 = vcmp.lt.s32.totalorder %v324_v8, 15 }
  0x86   : > { %v649_v40 = vrot.slane %v3719_v30, %v3516_v31  ;;  %v656_v50 = vrot.slane %v3719_v30, %v3531_v39  ;;  %v663_v2 = vrot.slane %v3719_v30, %v3550_v51 }
  0x88   : > { %917 = vbcast.lane.b32.xlu1 %v915_v47, 256  ;;  %v3733_v47 = vsel %vm351_vm9, %v320_v18, 15  ;;  %v5161_v18 = vmov 0.0   ;;  %vm2666_vm9 = vcmask 1041409  }
  0x89   : > { %553 = vbcast.lane.b32.xlu0 %v551_v48, 256  ;;  %v642_v48 = vrot.slane %v3719_v30, %v3513_v27  ;;  %v1097_v57 = vrot.slane %v3733_v47, %v3516_v31  ;;  %v1104_v62 = vrot.slane %v3733_v47, %v3531_v39  ;;  %v1111_v3 = vrot.slane %v3733_v47, %v3550_v51 }
  0x8c   : > { %1001 = vbcast.lane.b32.xlu1 %v999_v60, 256  ;;  %v3751_v60 = vsel %vm337_vm12, %v306_v29, 15 }
  0x8d   : > { %952 = vbcast.lane.b32.xlu0 %v950_v49, 256  ;;  %v1090_v49 = vrot.slane %v3733_v47, %v3513_v27 }
  0x90   : > { %560 = vbcast.lane.b32.xlu1 %v558_v0, 256  ;;  %v670_v0 = vrot.slane %v3719_v30, %v3564_v61 }
  0x91   : > { %511 = vbcast.lane.b32.xlu0 %v509_v5, 256 }
  0x94   : > { %595 = vbcast.lane.b32.xlu1 %v593_v14, 256 }
  0x95   : > { %588 = vbcast.lane.b32.xlu0 %v586_v15, 256  ;;  %v3780_v15 = vsel %vm339_vm15, %v308_v52, 15 }
  0x98   : > { %1008 = vbcast.lane.b32.xlu1 %v1006_v17, 256 }
  0x99   : > { %959 = vbcast.lane.b32.xlu0 %v957_v16, 256 }
  0x9c   : > { %1043 = vbcast.lane.b32.xlu1 %v1041_v37, 256 }
  0x9d   : > { %1036 = vbcast.lane.b32.xlu0 %v1034_v44, 256 }
  0x9e   : > { %v813_v34 = vpop.permute.xlu1 %812 }
  0x9f   : > { %v365_v10 = vpop.permute.xlu0 %364  ;;  %vm1319_vm0 = vcmp.eq.s32.totalorder %v813_v34, %v3695_v12 }
  0xa0   : > { %vm1255_vm1 = vcmp.eq.s32.totalorder %v365_v10, %v3695_v12  ;;  %v3128_v11 = vsel %vm1319_vm0, 1.0, %v5161_v18  ;;  %567 = vbcast.lane.b32.xlu1 %v565_v19, 256 }
  0xa1   : > { %v3064_v21 = vsel %vm1255_vm1, 1.0, %v5161_v18  ;;  %518 = vbcast.lane.b32.xlu0 %v516_v33, 256  ;;  %v2088_v37 = vsel %vm1639_vm11, %v3128_v11, 0.0 }
  0xa2   : > { %v1640_v42 = vsel %vm1639_vm11, %v3064_v21, 0.0  ;;  %v2089_v52 = vrot.slane %v2088_v37, 4  ;;  %v820_v34 = vpop.permute.xlu1 %819  ;;  %v3812_v21 = vsel %vm355_vm2, %v324_v8, 15 }
  0xa3   : > { %v1641_v19 = vrot.slane %v1640_v42, 4  ;;  %v372_v10 = vpop.permute.xlu0 %371  ;;  %vm1320_vm3 = vcmp.eq.s32.totalorder %v820_v34, %v3695_v12 }
  0xa4   : > { %vm1256_vm4 = vcmp.eq.s32.totalorder %v372_v10, %v3695_v12  ;;  %v2090_v44 = vadd.f32 %v2089_v52, %v2088_v37  ;;  %v3129_v17 = vsel %vm1320_vm3, 1.0, %v5161_v18  ;;  %644 = vbcast.lane.b32.xlu1 %v642_v48, 256 }
  0xa5   : > { %v1642_v43 = vadd.f32 %v1641_v19, %v1640_v42  ;;  %v3065_v16 = vsel %vm1256_vm4, 1.0, %v5161_v18  ;;  %602 = vbcast.lane.b32.xlu0 %v600_v38, 256  ;;  %v2095_v34 = vsel %vm1639_vm11, %v3129_v17, 0.0  ;;  %v2537_v17 = vld [vmem:[%s5159_s3 + $0x8] sm:$0xff] }
  0xa6   : > { %v1647_v10 = vsel %vm1639_vm11, %v3065_v16, 0.0  ;;  %v2096_v37 = vrot.slane %v2095_v34, 4  ;;  %v421_v52 = vpop.permute.xlu1 %420  ;;  %v2536_v16 = vld [vmem:[%s5159_s3] sm:$0xff]  ;;  %v2091_v48 = vrot.slane %v2090_v44, 2 }
  0xa7   : > { %v1648_v42 = vrot.slane %v1647_v10, 4  ;;  %v379_v19 = vpop.permute.xlu0 %378  ;;  %vm1263_vm5 = vcmp.eq.s32.totalorder %v421_v52, %v3695_v12  ;;  %v3260_v11 = vpack.c.bf16 %v2537_v17, %v2536_v16  ;;  %v1643_v29 = vrot.slane %v1642_v43, 2 }
  0xa8   : > { %vm1257_vm6 = vcmp.eq.s32.totalorder %v379_v19, %v3695_v12  ;;  %v2097_v33 = vadd.f32 %v2096_v37, %v2095_v34  ;;  %966 = vbcast.lane.b32.xlu1 %v964_v24, 256  ;;  %v3072_v14 = vsel %vm1263_vm5, 1.0, %v5161_v18  ;;  %v2092_v19 = vadd.f32 %v2091_v48, %v2090_v44 }
  0xa9   : > { %v1649_v38 = vadd.f32 %v1648_v42, %v1647_v10  ;;  %v3066_v13 = vsel %vm1257_vm6, 1.0, %v5161_v18  ;;  %651 = vbcast.lane.b32.xlu0 %v649_v40, 256  ;;  %3261 = vmatprep.subr.bf16.mxu0 %v3260_v11  ;;  %v1696_v40 = vsel %vm1639_vm11, %v3072_v14, 0.0  ;;  %v1644_v52 = vadd.f32 %v1643_v29, %v1642_v43 }
  0xaa   : > { %v2098_v34 = vrot.slane %v2097_v33, 2  ;;  %v827_v37 = vpop.permute.xlu1 %826  ;;  %3263 = vmatpush3.bf16.msra.mxu0 %v3260_v11  ;;  %3264 = vmatprep.subr.bf16.mxu1 %v3260_v11  ;;  %v1654_v17 = vsel %vm1639_vm11, %v3066_v13, 0.0  ;;  %v1697_v16 = vrot.slane %v1696_v40, 4  ;;  %vm2668_vm5 = vcmask 1042434  }
  0xab   : > { %v1650_v10 = vrot.slane %v1649_v38, 2  ;;  %v428_v42 = vpop.permute.xlu0 %427  ;;  %vm1321_vm7 = vcmp.eq.s32.totalorder %v827_v37, %v3695_v12  ;;  %3265 = vmatpush3.bf16.msra.mxu1 %v3260_v11  ;;  %v1655_v24 = vrot.slane %v1654_v17, 4  ;;  %v2093_v37 = vrot.slane %v2092_v19, 1 }
  0xac   : > { %vm1264_vm8 = vcmp.eq.s32.totalorder %v428_v42, %v3695_v12  ;;  %v2099_v8 = vadd.f32 %v2098_v34, %v2097_v33  ;;  %1050 = vbcast.lane.b32.xlu1 %v1048_v45, 256  ;;  %v3130_v14 = vsel %vm1321_vm7, 1.0, %v5161_v18  ;;  %v1645_v42 = vrot.slane %v1644_v52, 1 }
  0xad   : > { %v1651_v1 = vadd.f32 %v1650_v10, %v1649_v38  ;;  %v3073_v13 = vsel %vm1264_vm8, 1.0, %v5161_v18  ;;  %1015 = vbcast.lane.b32.xlu0 %v1013_v25, 256  ;;  %v2102_v44 = vsel %vm1639_vm11, %v3130_v14, 0.0  ;;  %v1698_v38 = vadd.f32 %v1697_v16, %v1696_v40 }
  0xae   : > { %v1703_v29 = vsel %vm1639_vm11, %v3073_v13, 0.0  ;;  %v876_v43 = vpop.permute.xlu1 %875  ;;  %v2100_v48 = vrot.slane %v2099_v8, 1  ;;  %v2103_v34 = vrot.slane %v2102_v44, 4  ;;  %v1656_v13 = vadd.f32 %v1655_v24, %v1654_v17 }
  0xaf   : > { %v869_v33 = vpop.permute.xlu0 %868  ;;  %v1704_v10 = vrot.slane %v1703_v29, 4  ;;  %vm1328_vm10 = vcmp.eq.s32.totalorder %v876_v43, %v3695_v12  ;;  %v1652_v14 = vrot.slane %v1651_v1, 1  ;;  %v1699_v7 = vrot.slane %v1698_v38, 2 }
  0xb0   : > { %vm1327_vm12 = vcmp.eq.s32.totalorder %v869_v33, %v3695_v12  ;;  %1099 = vbcast.lane.b32.xlu1 %v1097_v57, 256  ;;  %v3137_v16 = vsel %vm1328_vm10, 1.0, %v5161_v18  ;;  %v2101_v11 = vadd.f32 %v2100_v48, %v2099_v8  ;;  %v2104_v24 = vadd.f32 %v2103_v34, %v2102_v44 }
  0xb1   : > { %v1705_v45 = vadd.f32 %v1704_v10, %v1703_v29  ;;  %1092 = vbcast.lane.b32.xlu0 %v1090_v49, 256  ;;  %v3136_v40 = vsel %vm1327_vm12, 1.0, %v5161_v18  ;;  %v2151_v29 = vsel %vm1639_vm11, %v3137_v16, 0.0  ;;  %v2094_v10 = vadd.f32 %v2093_v37, %v2092_v19 }
  0xb2   : > { %v435_v43 = vpop.permute.xlu1 %434  ;;  %v2144_v49 = vsel %vm1639_vm11, %v3136_v40, 0.0  ;;  %v1646_v57 = vadd.f32 %v1645_v42, %v1644_v52  ;;  %v1653_v5 = vadd.f32 %v1652_v14, %v1651_v1  ;;  %v1657_v25 = vrot.slane %v1656_v13, 2 }
  0xb3   : > { %v386_v33 = vpop.permute.xlu0 %385  ;;  %v1706_v17 = vrot.slane %v1705_v45, 2  ;;  %vm1265_vm13 = vcmp.eq.s32.totalorder %v435_v43, %v3695_v12  ;;  %v2152_v8 = vrot.slane %v2151_v29, 4  ;;  %v2145_v44 = vrot.slane %v2144_v49, 4 }
  0xb4   : > { %vm1258_vm14 = vcmp.eq.s32.totalorder %v386_v33, %v3695_v12  ;;  %574 = vbcast.lane.b32.xlu1 %v572_v26, 256  ;;  %v3074_v48 = vsel %vm1265_vm13, 1.0, %v5161_v18  ;;  %v3902_v43 = vsel %vm2666_vm9, %v2101_v11, %v2094_v10  ;;  %v1700_v26 = vadd.f32 %v1699_v7, %v1698_v38 }
  0xb5   : > { %525 = vbcast.lane.b32.xlu0 %v523_v28, 256  ;;  %v3067_v34 = vsel %vm1258_vm14, 1.0, %v5161_v18  ;;  %v2105_v19 = vrot.slane %v2104_v24, 2  ;;  %v1707_v52 = vadd.f32 %v1706_v17, %v1705_v45  ;;  %v2153_v1 = vadd.f32 %v2152_v8, %v2151_v29 }
  0xb6   : > { %v883_v16 = vpop.permute.xlu1 %882  ;;  %v2146_v37 = vadd.f32 %v2145_v44, %v2144_v49  ;;  %v1710_v42 = vsel %vm1639_vm11, %v3074_v48, 0.0  ;;  %v1661_v22 = vsel %vm1639_vm11, %v3067_v34, 0.0  ;;  %v3910_v28 = vsel %vm2666_vm9, %v1653_v5, %v1646_v57 }
  0xb7   : > { %v834_v40 = vpop.permute.xlu0 %833  ;;  %v1658_v14 = vadd.f32 %v1657_v25, %v1656_v13  ;;  %v1711_v33 = vrot.slane %v1710_v42, 4  ;;  %v1662_v11 = vrot.slane %v1661_v22, 4  ;;  %v2154_v7 = vrot.slane %v2153_v1, 2 }
  0xb8   : > { %658 = vbcast.lane.b32.xlu1 %v656_v50, 256  ;;  %v2147_v45 = vrot.slane %v2146_v37, 2  ;;  %vm1329_vm15 = vcmp.eq.s32.totalorder %v883_v16, %v3695_v12  ;;  %vm1322_vm0 = vcmp.eq.s32.totalorder %v834_v40, %v3695_v12  ;;  %v2106_v29 = vadd.f32 %v2105_v19, %v2104_v24 }
  0xb9   : > { %609 = vbcast.lane.b32.xlu0 %v607_v53, 256  ;;  %v1708_v50 = vrot.slane %v1707_v52, 1  ;;  %v1712_v49 = vadd.f32 %v1711_v33, %v1710_v42  ;;  %v3138_v5 = vsel %vm1329_vm15, 1.0, %v5161_v18  ;;  %v1701_v25 = vrot.slane %v1700_v26, 1 }
  0xba   : > { %v442_v38 = vpop.permute.xlu1 %441  ;;  %v1663_v13 = vadd.f32 %v1662_v11, %v1661_v22  ;;  %v2158_v57 = vsel %vm1639_vm11, %v3138_v5, 0.0  ;;  %v3131_v10 = vsel %vm1322_vm0, 1.0, %v5161_v18  ;;  %v2155_v53 = vadd.f32 %v2154_v7, %v2153_v1 }
  0xbb   : > { %v393_v17 = vpop.permute.xlu0 %392  ;;  %v2148_v8 = vadd.f32 %v2147_v45, %v2146_v37  ;;  %v2159_v44 = vrot.slane %v2158_v57, 4  ;;  %v2109_v48 = vsel %vm1639_vm11, %v3131_v10, 0.0  ;;  %v1659_v24 = vrot.slane %v1658_v14, 1 }
  0xbc   : > { %1022 = vbcast.lane.b32.xlu1 %v1020_v32, 256  ;;  %v1713_v34 = vrot.slane %v1712_v49, 2  ;;  %v2110_v16 = vrot.slane %v2109_v48, 4  ;;  %vm1266_vm1 = vcmp.eq.s32.totalorder %v442_v38, %v3695_v12  ;;  %v2107_v42 = vrot.slane %v2106_v29, 1 }
  0xbd   : > { %973 = vbcast.lane.b32.xlu0 %v971_v36, 256  ;;  %v1709_v22 = vadd.f32 %v1708_v50, %v1707_v52  ;;  %v2160_v33 = vadd.f32 %v2159_v44, %v2158_v57  ;;  %v3075_v32 = vsel %vm1266_vm1, 1.0, %v5161_v18  ;;  %v1702_v1 = vadd.f32 %v1701_v25, %v1700_v26 }
  0xbe   : > { %v890_v40 = vpop.permute.xlu1 %889  ;;  %v1664_v37 = vrot.slane %v1663_v13, 2  ;;  %v2111_v11 = vadd.f32 %v2110_v16, %v2109_v48  ;;  %v1717_v7 = vsel %vm1639_vm11, %v3075_v32, 0.0  ;;  %v2156_v35 = vrot.slane %v2155_v53, 1 }
  0xbf   : > { %v841_v19 = vpop.permute.xlu0 %840  ;;  %v2149_v36 = vrot.slane %v2148_v8, 1  ;;  %v2161_v45 = vrot.slane %v2160_v33, 2  ;;  %v1718_v38 = vrot.slane %v1717_v7, 4  ;;  %v3936_v52 = vadd.f32 %v1659_v24, %v1658_v14 }
  0xc0   : > { %1106 = vbcast.lane.b32.xlu1 %v1104_v62, 256  ;;  %v1714_v50 = vadd.f32 %v1713_v34, %v1712_v49  ;;  %vm1259_vm2 = vcmp.eq.s32.totalorder %v393_v17, %v3695_v12  ;;  %vm1330_vm3 = vcmp.eq.s32.totalorder %v890_v40, %v3695_v12  ;;  %v3940_v25 = vadd.f32 %v2107_v42, %v2106_v29 }
  0xc1   : > { %1057 = vbcast.lane.b32.xlu0 %v1055_v54, 256  ;;  %v2680_v62 = vsel %vm2666_vm9, %v1709_v22, %v1702_v1  ;;  %v2162_v57 = vadd.f32 %v2161_v45, %v2160_v33  ;;  %v2112_v10 = vrot.slane %v2111_v11, 2  ;;  %v1719_v44 = vadd.f32 %v1718_v38, %v1717_v7 }
  0xc2   : > { %v449_v26 = vpop.permute.xlu1 %448  ;;  %v3068_v48 = vsel %vm1259_vm2, 1.0, %v5161_v18  ;;  %v3139_v54 = vsel %vm1330_vm3, 1.0, %v5161_v18  ;;  %vm1323_vm4 = vcmp.eq.s32.totalorder %v841_v19, %v3695_v12  ;;  %v2157_v14 = vadd.f32 %v2156_v35, %v2155_v53 }
  0xc3   : > { %v400_v5 = vpop.permute.xlu0 %399  ;;  %v2150_v17 = vadd.f32 %v2149_v36, %v2148_v8  ;;  %v1665_v49 = vadd.f32 %v1664_v37, %v1663_v13  ;;  %v1668_v29 = vsel %vm1639_vm11, %v3068_v48, 0.0  ;;  %v1715_v24 = vrot.slane %v1714_v50, 1 }
  0xc4   : > { %616 = vbcast.lane.b32.xlu1 %v614_v55, 256  ;;  %v1669_v34 = vrot.slane %v1668_v29, 4  ;;  %v2165_v16 = vsel %vm1639_vm11, %v3139_v54, 0.0  ;;  %v3132_v40 = vsel %vm1323_vm4, 1.0, %v5161_v18  ;;  %v2163_v22 = vrot.slane %v2162_v57, 1 }
  0xc5   : > { %581 = vbcast.lane.b32.xlu0 %v579_v58, 256  ;;  %v2113_v55 = vadd.f32 %v2112_v10, %v2111_v11  ;;  %v2166_v53 = vrot.slane %v2165_v16, 4  ;;  %v2116_v13 = vsel %vm1639_vm11, %v3132_v40, 0.0  ;;  %v1720_v8 = vrot.slane %v1719_v44, 2 }
  0xc6   : > { %v484_v19 = vpop.permute.xlu1 %483  ;;  %v1670_v33 = vadd.f32 %v1669_v34, %v1668_v29  ;;  %v2117_v32 = vrot.slane %v2116_v13, 4  ;;  %vm1267_vm6 = vcmp.eq.s32.totalorder %v449_v26, %v3695_v12  ;;  %v2736_v46 = vsel %vm2666_vm9, %v2157_v14, %v2150_v17 }
  0xc7   : > { %v477_v42 = vpop.permute.xlu0 %476  ;;  %v1666_v58 = vrot.slane %v1665_v49, 1  ;;  %v2167_v1 = vadd.f32 %v2166_v53, %v2165_v16  ;;  %v3076_v37 = vsel %vm1267_vm6, 1.0, %v5161_v18  ;;  %vm1260_vm7 = vcmp.eq.s32.totalorder %v400_v5, %v3695_v12 }
  0xc8   : > { %1029 = vbcast.lane.b32.xlu1 %v1027_v63, 256  ;;  %v1671_v11 = vrot.slane %v1670_v33, 2  ;;  %v2118_v7 = vadd.f32 %v2117_v32, %v2116_v13  ;;  %v1724_v35 = vsel %vm1639_vm11, %v3076_v37, 0.0  ;;  %v1716_v56 = vadd.f32 %v1715_v24, %v1714_v50 }
  0xc9   : > { %665 = vbcast.lane.b32.xlu0 %v663_v2, 256  ;;  %v2114_v63 = vrot.slane %v2113_v55, 1  ;;  %v1725_v38 = vrot.slane %v1724_v35, 4  ;;  %v3069_v26 = vsel %vm1260_vm7, 1.0, %v5161_v18  ;;  %v2164_v10 = vadd.f32 %v2163_v22, %v2162_v57 }
  0xca   : > { %v897_v36 = vpop.permute.xlu1 %896  ;;  %v3968_v48 = vadd.f32 %v1720_v8, %v1719_v44  ;;  %v1675_v54 = vsel %vm1639_vm11, %v3069_v26, 0.0  ;;  %vm1272_vm8 = vcmp.eq.s32.totalorder %v484_v19, %v3695_v12  ;;  %v2168_v2 = vrot.slane %v2167_v1, 2 }
  0xcb   : > { %v848_v45 = vpop.permute.xlu0 %847  ;;  %v2119_v5 = vrot.slane %v2118_v7, 2  ;;  %v1676_v14 = vrot.slane %v1675_v54, 4  ;;  %v3081_v50 = vsel %vm1272_vm8, 1.0, %v5161_v18  ;;  %v3979_v57 = vadd.f32 %v1666_v58, %v1665_v49 }
  0xcc   : > { %1113 = vbcast.lane.b32.xlu1 %v1111_v3, 256  ;;  %v3981_v44 = vadd.f32 %v1671_v11, %v1670_v33  ;;  %v1759_v17 = vsel %vm1639_vm11, %v3081_v50, 0.0  ;;  %vm1271_vm10 = vcmp.eq.s32.totalorder %v477_v42, %v3695_v12  ;;  %v3986_v3 = vsel %vm2668_vm5, %v1716_v56, %v2680_v62 }
  0xcd   : > { %1064 = vbcast.lane.b32.xlu0 %v1062_v4, 256  ;;  %5168 = vst [vmem:[#allocation6_spill] sm:$0xff] %v3986_v3  ;;  %v1726_v34 = vadd.f32 %v1725_v38, %v1724_v35  ;;  %v1677_v16 = vadd.f32 %v1676_v14, %v1675_v54  ;;  %v1760_v40 = vrot.slane %v1759_v17, 4  ;;  %v3989_v19 = vsel %vm2668_vm5, %v2164_v10, %v2736_v46 }
  0xce   : > { %v932_v29 = vpop.permute.xlu1 %931  ;;  %5169 = vst [vmem:[#allocation7_spill] sm:$0xff] %v3989_v19  ;;  %v3991_v4 = vadd.f32 %v2114_v63, %v2113_v55  ;;  %v3080_v49 = vsel %vm1271_vm10, 1.0, %v5161_v18  ;;  %vm1331_vm12 = vcmp.eq.s32.totalorder %v897_v36, %v3695_v12  ;;  %v1722_v42 = vrot.slane %v3968_v48, 1 }
  0xcf   : > { %v925_v24 = vpop.permute.xlu0 %924  ;;  %v3999_v62 = vadd.f32 %v2168_v2, %v2167_v1  ;;  %v4001_v22 = vadd.f32 %v2119_v5, %v2118_v7  ;;  %v1761_v53 = vadd.f32 %v1760_v40, %v1759_v17  ;;  %v5170_v13 = vrot.slane %v3692_v6, %v3577_v9 }
  0xd0   : > { %672 = vbcast.lane.b32.xlu1 %v670_v0, 256  ;;  %v1673_v55 = vrot.slane %v3981_v44, 1  ;;  %v1752_v8 = vsel %vm1639_vm11, %v3080_v49, 0.0  ;;  %v3140_v33 = vsel %vm1331_vm12, 1.0, %v5161_v18  ;;  %vm1324_vm13 = vcmp.eq.s32.totalorder %v848_v45, %v3695_v12 }
  0xd1   : > { %623 = vbcast.lane.b32.xlu0 %v5170_v13, 256  ;;  %v1727_v46 = vrot.slane %v1726_v34, 2  ;;  %v1678_v58 = vrot.slane %v1677_v16, 2  ;;  %v1762_v1 = vrot.slane %v1761_v53, 2  ;;  %v1753_v37 = vrot.slane %v1752_v8, 4 }
  0xd2   : > { %v456_v0 = vpop.permute.xlu1 %455  ;;  %v2172_v11 = vsel %vm1639_vm11, %v3140_v33, 0.0  ;;  %v3133_v7 = vsel %vm1324_vm13, 1.0, %v5161_v18  ;;  %vm1336_vm14 = vcmp.eq.s32.totalorder %v932_v29, %v3695_v12  ;;  %vm1335_vm15 = vcmp.eq.s32.totalorder %v925_v24, %v3695_v12 }
  0xd3   : > { %v407_v32 = vpop.permute.xlu0 %406  ;;  %v5171_v35 = vrot.slane %v3751_v60, %v3516_v31  ;;  %v2170_v36 = vrot.slane %v3999_v62, 1  ;;  %v2121_v45 = vrot.slane %v4001_v22, 1  ;;  %v1763_v56 = vadd.f32 %v1762_v1, %v1761_v53 }
  0xd4   : > { %v1754_v63 = vadd.f32 %v1753_v37, %v1752_v8  ;;  %v5172_v38 = vrot.slane %v3751_v60, %v3513_v27  ;;  %v2173_v26 = vrot.slane %v2172_v11, 4  ;;  %v2123_v10 = vsel %vm1639_vm11, %v3133_v7, 0.0 }
  0xd5   : > { %707 = vbcast.lane.b32.xlu1 %v5171_v35, 256  ;;  %v3145_v54 = vsel %vm1336_vm14, 1.0, %v5161_v18  ;;  %v3144_v2 = vsel %vm1335_vm15, 1.0, %v5161_v18  ;;  %v1728_v50 = vadd.f32 %v1727_v46, %v1726_v34  ;;  %v1679_v17 = vadd.f32 %v1678_v58, %v1677_v16 }
  0xd6   : > { %700 = vbcast.lane.b32.xlu0 %v5172_v38, 256  ;;  %v533_v5 = vpop.permute.xlu1 %532  ;;  %v1755_v29 = vrot.slane %v1754_v63, 2  ;;  %v2124_v24 = vrot.slane %v2123_v10, 4  ;;  %v2174_v40 = vadd.f32 %v2173_v26, %v2172_v11  ;;  %v2207_v49 = vsel %vm1639_vm11, %v3145_v54, 0.0 }
  0xd7   : > { %v4025_v14 = vpop.permute.xlu0 %490  ;;  %v2200_v53 = vsel %vm1639_vm11, %v3144_v2, 0.0  ;;  %vm1268_vm0 = vcmp.eq.s32.totalorder %v456_v0, %v3695_v12  ;;  %v5173_v13 = vrot.slane %v3733_v47, %v3564_v61  ;;  %v1764_v8 = vrot.slane %v1763_v56, 1 }
  0xd8   : > { %v1756_v33 = vadd.f32 %v1755_v29, %v1754_v63  ;;  %v2125_v1 = vadd.f32 %v2124_v24, %v2123_v10  ;;  %v2208_v37 = vrot.slane %v2207_v49, 4  ;;  %v5174_v34 = vrot.slane %v3709_v23, %v3577_v9 }
  0xd9   : > { %1120 = vbcast.lane.b32.xlu1 %v5173_v13, 256  ;;  %v2175_v16 = vrot.slane %v2174_v40, 2  ;;  %v2201_v46 = vrot.slane %v2200_v53, 4  ;;  %v3077_v58 = vsel %vm1268_vm0, 1.0, %v5161_v18  ;;  %vm1261_vm1 = vcmp.eq.s32.totalorder %v407_v32, %v3695_v12 }
  0xda   : > { %1071 = vbcast.lane.b32.xlu0 %v5174_v34, 256  ;;  %v855_v11 = vpop.permute.xlu1 %854  ;;  %v1757_v7 = vrot.slane %v1756_v33, 1  ;;  %v2126_v35 = vrot.slane %v2125_v1, 2  ;;  %v2209_v38 = vadd.f32 %v2208_v37, %v2207_v49  ;;  %v1731_v63 = vsel %vm1639_vm11, %v3077_v58, 0.0 }
  0xdb   : > { %v4038_v0 = vpop.permute.xlu0 %539  ;;  %v2176_v26 = vadd.f32 %v2175_v16, %v2174_v40  ;;  %v2202_v10 = vadd.f32 %v2201_v46, %v2200_v53  ;;  %v1732_v54 = vrot.slane %v1731_v63, 4  ;;  %v3070_v2 = vsel %vm1261_vm1, 1.0, %v5161_v18 }
  0xdc   : > { %v5175_v29 = vrot.slane %v3765_v20, %v3516_v31  ;;  %v4046_v24 = vadd.f32 %v1722_v42, %v3968_v48  ;;  %v1729_v32 = vrot.slane %v1728_v50, 1  ;;  %v1680_v13 = vrot.slane %v1679_v17, 1 }
  0xdd   : > { %v1682_v34 = vsel %vm1639_vm11, %v3070_v2, 0.0  ;;  %v5177_v49 = vrot.slane %v3765_v20, %v3513_v27  ;;  %v4053_v40 = vadd.f32 %v1673_v55, %v3981_v44  ;;  %v2127_v53 = vadd.f32 %v2126_v35, %v2125_v1 }
  0xde   : > { %1155 = vbcast.lane.b32.xlu1 %v5175_v29, 256  ;;  %5176 = vst [vmem:[#allocation8_spill] sm:$0xff] %v4046_v24  ;;  %v2210_v37 = vrot.slane %v2209_v38, 2  ;;  %v2203_v16 = vrot.slane %v2202_v10, 2  ;;  %v939_v46 = vpop.permute.xlu1 %938  ;;  %v4056_v29 = vadd.f32 %v2170_v36, %v3999_v62  ;;  %v4059_v48 = vadd.f32 %v2121_v45, %v4001_v22 }
  0xdf   : > { %1148 = vbcast.lane.b32.xlu0 %v5177_v49, 256  ;;  %v904_v58 = vpop.permute.xlu0 %903  ;;  %v1733_v42 = vadd.f32 %v1732_v54, %v1731_v63  ;;  %vm1279_vm2 = vcmp.eq.s32.totalorder %v533_v5, %v3695_v12  ;;  %v1765_v2 = vadd.f32 %v1764_v8, %v1763_v56  ;;  %v1758_v18 = vadd.f32 %v1757_v7, %v1756_v33 }
  0xe0   : > { %5178 = vst [vmem:[#allocation9_spill] sm:$0xff] %v4056_v29  ;;  %v2177_v49 = vrot.slane %v2176_v26, 1  ;;  %v1683_v19 = vrot.slane %v1682_v34, 4  ;;  %v5179_v44 = vrot.slane %v3719_v30, %v3577_v9  ;;  %v4065_v55 = vadd.f32 %v1729_v32, %v1728_v50 }
  0xe1   : > { %v4067_v1 = vadd.f32 %v1680_v13, %v1679_v17  ;;  %v5181_v62 = vmov 0.0   ;;  %vm1273_vm3 = vcmp.eq.s32.totalorder %v4025_v14, %v3695_v12  ;;  %v5182_v22 = vrot.slane %v3692_v6, %v3607_v41 }
  0xe2   : > { %679 = vbcast.lane.b32.xlu1 %v5179_v44, 256  ;;  %5180 = vst [vmem:[#allocation10_spill] sm:$0xff] %v4065_v55  ;;  %v3088_v36 = vsel %vm1279_vm2, 1.0, %v5181_v62  ;;  %v2128_v45 = vrot.slane %v2127_v53, 1  ;;  %v2211_v56 = vadd.f32 %v2210_v37, %v2209_v38  ;;  %v2204_v5 = vadd.f32 %v2203_v16, %v2202_v10  ;;  %v988_v33 = vpop.permute.xlu1 %987 }
  0xe3   : > { %630 = vbcast.lane.b32.xlu0 %v5182_v22, 256  ;;  %v1808_v8 = vsel %vm1639_vm11, %v3088_v36, 0.0  ;;  %v981_v7 = vpop.permute.xlu0 %980  ;;  %v1734_v50 = vrot.slane %v1733_v42, 2  ;;  %v3082_v17 = vsel %vm1273_vm3, 1.0, %v5181_v62  ;;  %vm1325_vm4 = vcmp.eq.s32.totalorder %v855_v11, %v3695_v12 }
  0xe4   : > { %v1809_v35 = vrot.slane %v1808_v8, 4  ;;  %v4079_v63 = vsel %vm2666_vm9, %v1765_v2, %v1758_v18  ;;  %v4081_v14 = vadd.f32 %v2177_v49, %v2176_v26  ;;  %v4083_v54 = vadd.f32 %v1683_v19, %v1682_v34 }
  0xe5   : > { %v1766_v38 = vsel %vm1639_vm11, %v3082_v17, 0.0  ;;  %v5184_v10 = vrot.slane %v3780_v15, %v3513_v27  ;;  %v3134_v37 = vsel %vm1325_vm4, 1.0, %v5181_v62  ;;  %vm1280_vm6 = vcmp.eq.s32.totalorder %v4038_v0, %v3695_v12 }
  0xe6   : > { %5183 = vst [vmem:[#allocation11_spill] sm:$0xff] %v4081_v14  ;;  %v1810_v32 = vadd.f32 %v1809_v35, %v1808_v8  ;;  %v1767_v13 = vrot.slane %v1766_v38, 4  ;;  %v5185_v18 = vrot.slane %v3751_v60, %v3531_v39  ;;  %v4095_v11 = vadd.f32 %v2128_v45, %v2127_v53  ;;  %v463_v16 = vpop.permute.xlu1 %462 }
  0xe7   : > { %756 = vbcast.lane.b32.xlu1 %v5184_v10, 256  ;;  %v2212_v19 = vrot.slane %v2211_v56, 1  ;;  %v2205_v26 = vrot.slane %v2204_v5, 1  ;;  %v2130_v34 = vsel %vm1639_vm11, %v3134_v37, 0.0  ;;  %v4098_v2 = vpop.permute.xlu0 %413  ;;  %v4100_v49 = vadd.f32 %v1734_v50, %v1733_v42 }
  0xe8   : > { %714 = vbcast.lane.b32.xlu0 %v5185_v18, 256  ;;  %v1768_v44 = vadd.f32 %v1767_v13, %v1766_v38  ;;  %v2131_v36 = vrot.slane %v2130_v34, 4  ;;  %v3089_v22 = vsel %vm1280_vm6, 1.0, %v5181_v62  ;;  %vm1337_vm7 = vcmp.eq.s32.totalorder %v939_v46, %v3695_v12 }
  0xe9   : > { %v1815_v0 = vsel %vm1639_vm11, %v3089_v22, 0.0  ;;  %vm1332_vm8 = vcmp.eq.s32.totalorder %v904_v58, %v3695_v12  ;;  %vm1344_vm10 = vcmp.eq.s32.totalorder %v988_v33, %v3695_v12  ;;  %v5186_v53 = vrot.slane %v3709_v23, %v3607_v41 }
  0xea   : > { %v1811_v45 = vrot.slane %v1810_v32, 2  ;;  %v1769_v8 = vrot.slane %v1768_v44, 2  ;;  %v2132_v42 = vadd.f32 %v2131_v36, %v2130_v34  ;;  %v1816_v50 = vrot.slane %v1815_v0, 4  ;;  %v4117_v33 = vpop.permute.xlu1 %546 }
  0xeb   : > { %1078 = vbcast.lane.b32.xlu1 %v5186_v53, 256  ;;  %v5187_v35 = vrot.slane %v3780_v15, %v3516_v31  ;;  %v3146_v17 = vsel %vm1337_vm7, 1.0, %v5181_v62  ;;  %v3141_v46 = vsel %vm1332_vm8, 1.0, %v5181_v62  ;;  %v3153_v58 = vsel %vm1344_vm10, 1.0, %v5181_v62  ;;  %v4119_v38 = vpop.permute.xlu0 %497 }
  0xec   : > { %vm1343_vm12 = vcmp.eq.s32.totalorder %v981_v7, %v3695_v12  ;;  %v2213_v10 = vadd.f32 %v2212_v19, %v2211_v56  ;;  %v1685_v13 = vrot.slane %v4083_v54, 2  ;;  %v1770_v37 = vadd.f32 %v1769_v8, %v1768_v44 }
  0xed   : > { %763 = vbcast.lane.b32.xlu0 %v5187_v35, 256  ;;  %v1817_v18 = vadd.f32 %v1816_v50, %v1815_v0  ;;  %v2214_v34 = vsel %vm1639_vm11, %v3146_v17, 0.0  ;;  %v2179_v36 = vsel %vm1639_vm11, %v3141_v46, 0.0  ;;  %v2263_v22 = vsel %vm1639_vm11, %v3153_v58, 0.0 }
  0xee   : > { %v3152_v53 = vsel %vm1343_vm12, 1.0, %v5181_v62  ;;  %v5188_v7 = vrot.slane %v3765_v20, %v3531_v39  ;;  %v2206_v35 = vadd.f32 %v2205_v26, %v2204_v5  ;;  %v1812_v14 = vadd.f32 %v1811_v45, %v1810_v32  ;;  %v4133_v17 = vpop.permute.xlu1 %910 }
  0xef   : > { %v2133_v29 = vrot.slane %v2132_v42, 2  ;;  %v1818_v56 = vrot.slane %v1817_v18, 2  ;;  %v5189_v19 = vrot.slane %v3733_v47, %v3577_v9  ;;  %v2215_v44 = vrot.slane %v2214_v34, 4  ;;  %v4135_v46 = vpop.permute.xlu0 %861 }
  0xf0   : > { %1162 = vbcast.lane.b32.xlu1 %v5188_v7, 256  ;;  %v2180_v0 = vrot.slane %v2179_v36, 4  ;;  %v2264_v8 = vrot.slane %v2263_v22, 4  ;;  %v2256_v50 = vsel %vm1639_vm11, %v3152_v53, 0.0  ;;  %v1736_v58 = vrot.slane %v4100_v49, 1 }
  0xf1   : > { %1127 = vbcast.lane.b32.xlu0 %v5189_v19, 256  ;;  %v1771_v7 = vrot.slane %v1770_v37, 1  ;;  %v1819_v5 = vadd.f32 %v1818_v56, %v1817_v18  ;;  %v2257_v32 = vrot.slane %v2256_v50, 4  ;;  %v2216_v26 = vadd.f32 %v2215_v44, %v2214_v34 }
  0xf2   : > { %v2181_v45 = vadd.f32 %v2180_v0, %v2179_v36  ;;  %v2265_v55 = vadd.f32 %v2264_v8, %v2263_v22  ;;  %vm1269_vm13 = vcmp.eq.s32.totalorder %v463_v16, %v3695_v12  ;;  %v5190_v19 = vrot.slane %v3812_v21, %v3516_v31  ;;  %v995_v31 = vpop.permute.xlu1 %994 }
  0xf3   : > { %v4143_v53 = vadd.f32 %v1685_v13, %v4083_v54  ;;  %v1813_v9 = vrot.slane %v1812_v14, 1  ;;  %v2258_v24 = vadd.f32 %v2257_v32, %v2256_v50  ;;  %v3078_v3 = vsel %vm1269_vm13, 1.0, %v5181_v62  ;;  %v4154_v56 = vpop.permute.xlu0 %945 }
  0xf4   : > { %1211 = vbcast.lane.b32.xlu1 %v5190_v19, 256  ;;  %v5191_v18 = vrot.slane %v3812_v21, %v3513_v27  ;;  %v4150_v34 = vsel %vm2666_vm9, %v2213_v10, %v2206_v35  ;;  %v4152_v36 = vadd.f32 %v2133_v29, %v2132_v42  ;;  %v1820_v16 = vrot.slane %v1819_v5, 1 }
  0xf5   : > { %v2266_v22 = vrot.slane %v2265_v55, 2  ;;  %v2217_v54 = vrot.slane %v2216_v26, 2  ;;  %v2259_v13 = vrot.slane %v2258_v24, 2  ;;  %v1738_v44 = vsel %vm1639_vm11, %v3078_v3, 0.0 }
  0xf6   : > { %1204 = vbcast.lane.b32.xlu0 %v5191_v18, 256  ;;  %vm1262_vm14 = vcmp.eq.s32.totalorder %v4098_v2, %v3695_v12  ;;  %v1772_v0 = vadd.f32 %v1771_v7, %v1770_v37  ;;  %v2182_v27 = vrot.slane %v2181_v45, 2  ;;  %v5192_v29 = vrot.slane %v3719_v30, %v3607_v41  ;;  %v505_v19 = vpop.permute.xlu1 %504 }
  0xf7   : > { %v2267_v8 = vadd.f32 %v2266_v22, %v2265_v55  ;;  %v3071_v10 = vsel %vm1262_vm14, 1.0, %v5181_v62  ;;  %v4164_v42 = vadd.f32 %v1736_v58, %v4100_v49  ;;  %v1687_v35 = vrot.slane %v4143_v53, 1  ;;  %v4171_v18 = vpop.permute.xlu0 %469 }
  0xf8   : > { %686 = vbcast.lane.b32.xlu1 %v5192_v29, 256  ;;  %v1814_v50 = vadd.f32 %v1813_v9, %v1812_v14  ;;  %v2260_v32 = vadd.f32 %v2259_v13, %v2258_v24  ;;  %v5193_v3 = vrot.slane %v3692_v6, %v3634_v59  ;;  %v1821_v2 = vadd.f32 %v1820_v16, %v1819_v5 }
  0xf9   : > { %v2268_v37 = vrot.slane %v2267_v8, 1  ;;  %v1739_v55 = vrot.slane %v1738_v44, 4  ;;  %v1689_v7 = vsel %vm1639_vm11, %v3071_v10, 0.0  ;;  %v2218_v22 = vadd.f32 %v2217_v54, %v2216_v26 }
  0xfa   : > { %637 = vbcast.lane.b32.xlu0 %v5193_v3, 256  ;;  %v2261_v29 = vrot.slane %v2260_v32, 1  ;;  %vm1281_vm15 = vcmp.eq.s32.totalorder %v4117_v33, %v3695_v12  ;;  %vm1274_vm0 = vcmp.eq.s32.totalorder %v4119_v38, %v3695_v12  ;;  %v4179_v9 = vsel %vm2668_vm5, %v1772_v0, %v4079_v63  ;;  %v4197_v13 = vpop.permute.xlu1 %917 }
  0xfb   : > { %v4182_v24 = vadd.f32 %v2182_v27, %v2181_v45  ;;  %v2269_v14 = vadd.f32 %v2268_v37, %v2267_v8  ;;  %v5194_v49 = vrot.slane %v3780_v15, %v3531_v39  ;;  %v1690_v5 = vrot.slane %v1689_v7, 4  ;;  %v4199_v0 = vpop.permute.xlu0 %553 }
  0xfc   : > { %v2262_v58 = vadd.f32 %v2261_v29, %v2260_v32  ;;  %v3090_v33 = vsel %vm1281_vm15, 1.0, %v5181_v62  ;;  %v3083_v26 = vsel %vm1274_vm0, 1.0, %v5181_v62  ;;  %v5195_v38 = vrot.slane %v3751_v60, %v3550_v51 }
  0xfd   : > { %770 = vbcast.lane.b32.xlu1 %v5194_v49, 256  ;;  %v4193_v63 = vsel %vm2666_vm9, %v1821_v2, %v1814_v50  ;;  %v1740_v45 = vadd.f32 %v1739_v55, %v1738_v44  ;;  %v1822_v16 = vsel %vm1639_vm11, %v3090_v33, 0.0  ;;  %v1773_v54 = vsel %vm1639_vm11, %v3083_v26, 0.0 }
  0xfe   : > { %721 = vbcast.lane.b32.xlu0 %v5195_v38, 256  ;;  %v2219_v27 = vrot.slane %v2218_v22, 1  ;;  %v4202_v8 = vsel %vm2666_vm9, %v2269_v14, %v2262_v58  ;;  %v1823_v10 = vrot.slane %v1822_v16, 4  ;;  %v1774_v32 = vrot.slane %v1773_v54, 4 }
  0xff   : > { %vm1333_vm1 = vcmp.eq.s32.totalorder %v4133_v17, %v3695_v12  ;;  %vm1326_vm2 = vcmp.eq.s32.totalorder %v4135_v46, %v3695_v12  ;;  %vm1345_vm3 = vcmp.eq.s32.totalorder %v995_v31, %v3695_v12  ;;  %v5196_v44 = vrot.slane %v3733_v47, %v3607_v41  ;;  %v4222_v31 = vpop.permute.xlu1 %1001 }
 0x100   : > { %v1691_v50 = vadd.f32 %v1690_v5, %v1689_v7  ;;  %v1824_v2 = vadd.f32 %v1823_v10, %v1822_v16  ;;  %v1775_v37 = vadd.f32 %v1774_v32, %v1773_v54  ;;  %v3142_v55 = vsel %vm1333_vm1, 1.0, %v5181_v62  ;;  %v4224_v7 = vpop.permute.xlu0 %952 }
 0x101   : > { %1134 = vbcast.lane.b32.xlu1 %v5196_v44, 256  ;;  %v5197_v29 = vrot.slane %v3709_v23, %v3634_v59  ;;  %v2186_v17 = vsel %vm1639_vm11, %v3142_v55, 0.0  ;;  %v3135_v14 = vsel %vm1326_vm2, 1.0, %v5181_v62  ;;  %v3154_v46 = vsel %vm1345_vm3, 1.0, %v5181_v62 }
 0x102   : > { %vm1338_vm4 = vcmp.eq.s32.totalorder %v4154_v56, %v3695_v12  ;;  %v1741_v49 = vrot.slane %v1740_v45, 2  ;;  %v1825_v58 = vrot.slane %v1824_v2, 2  ;;  %vm2670_vm6 = vcmask 1043459  }
 0x103   : > { %1085 = vbcast.lane.b32.xlu0 %v5197_v29, 256  ;;  %v1776_v5 = vrot.slane %v1775_v37, 2  ;;  %v2137_v23 = vsel %vm1639_vm11, %v3135_v14, 0.0  ;;  %v2187_v33 = vrot.slane %v2186_v17, 4  ;;  %v2270_v26 = vsel %vm1639_vm11, %v3154_v46, 0.0 }
 0x104   : > { %v3147_v38 = vsel %vm1338_vm4, 1.0, %v5181_v62  ;;  %vm1275_vm7 = vcmp.eq.s32.totalorder %v505_v19, %v3695_v12  ;;  %vm2672_vm8 = vcmask 1044484   ;;  %v5198_v56 = vrot.slane %v3812_v21, %v3531_v39  ;;  %v4240_v39 = vpop.permute.xlu1 %560  ;;  %v4242_v19 = vpop.permute.xlu0 %511 }
 0x105   : > { %v2220_v16 = vadd.f32 %v2219_v27, %v2218_v22  ;;  %v1692_v54 = vrot.slane %v1691_v50, 2  ;;  %v1826_v10 = vadd.f32 %v1825_v58, %v1824_v2  ;;  %v2271_v32 = vrot.slane %v2270_v26, 4 }
 0x106   : > { %1218 = vbcast.lane.b32.xlu1 %v5198_v56, 256  ;;  %vm2674_vm10 = vcmask 1045509   ;;  %v5199_v44 = vrot.slane %v3765_v20, %v3550_v51  ;;  %v2138_v55 = vrot.slane %v2137_v23, 4  ;;  %v2221_v29 = vsel %vm1639_vm11, %v3147_v38, 0.0 }
 0x107   : > { %v3084_v14 = vsel %vm1275_vm7, 1.0, %v5181_v62  ;;  %vm1270_vm12 = vcmp.eq.s32.totalorder %v4171_v18, %v3695_v12  ;;  %vm2676_vm13 = vcmask 1046534   ;;  %v4244_v22 = vadd.f32 %v1741_v49, %v1740_v45 }
 0x108   : > { %1169 = vbcast.lane.b32.xlu0 %v5199_v44, 256  ;;  %v1827_v27 = vrot.slane %v1826_v10, 1  ;;  %v1777_v2 = vadd.f32 %v1776_v5, %v1775_v37  ;;  %v2272_v46 = vadd.f32 %v2271_v32, %v2270_v26  ;;  %vm2678_vm14 = vcmask 1047559   ;;  %v4257_v32 = vpop.permute.xlu1 %595 }
 0x109   : > { %v2188_v58 = vadd.f32 %v2187_v33, %v2186_v17  ;;  %v2222_v56 = vrot.slane %v2221_v29, 4  ;;  %v1780_v38 = vsel %vm1639_vm11, %v3084_v14, 0.0  ;;  %v3079_v44 = vsel %vm1270_vm12, 1.0, %v5181_v62  ;;  %v4259_v14 = vpop.permute.xlu0 %588 }
 0x10a   : > { %vm2785_vm15 = vcmask 130048   ;;  %v5200_v18 = vrot.slane %v3751_v60, %v3564_v61  ;;  %v2744_v3 = vsel %vm2668_vm5, %v2220_v16, %v4150_v34  ;;  %v1693_v45 = vadd.f32 %v1692_v54, %v1691_v50 }
 0x10b   : > { %v1828_v49 = vadd.f32 %v1827_v27, %v1826_v10  ;;  %v2273_v6 = vrot.slane %v2272_v46, 2  ;;  %v5201_v37 = vrot.slane %v3719_v30, %v3634_v59  ;;  %v2139_v17 = vadd.f32 %v2138_v55, %v2137_v23 }
 0x10c   : > { %728 = vbcast.lane.b32.xlu1 %v5200_v18, 256  ;;  %v2223_v5 = vadd.f32 %v2222_v56, %v2221_v29  ;;  %v1781_v33 = vrot.slane %v1780_v38, 4  ;;  %v1745_v26 = vsel %vm1639_vm11, %v3079_v44, 0.0  ;;  %v1743_v18 = vrot.slane %v4244_v22, 1 }
 0x10d   : > { %693 = vbcast.lane.b32.xlu0 %v5201_v37, 256  ;;  %v4264_v34 = vsel %vm2668_vm5, %v1828_v49, %v4193_v63  ;;  %v1778_v50 = vrot.slane %v1777_v2, 1  ;;  %v2274_v16 = vadd.f32 %v2273_v6, %v2272_v46  ;;  %v2189_v54 = vrot.slane %v2188_v58, 2  ;;  %v4274_v46 = vpop.permute.xlu1 %1008 }
 0x10e   : > { %v2224_v30 = vrot.slane %v2223_v5, 2  ;;  %v1782_v10 = vadd.f32 %v1781_v33, %v1780_v38  ;;  %v1746_v23 = vrot.slane %v1745_v26, 4  ;;  %v1688_v29 = vadd.f32 %v1687_v35, %v4143_v53  ;;  %v4276_v38 = vpop.permute.xlu0 %959 }
 0x10f   : > { %v2275_v55 = vrot.slane %v2274_v16, 1  ;;  %v1694_v27 = vrot.slane %v1693_v45, 1  ;;  %v2669_v56 = vsel %vm2668_vm5, %v3936_v52, %v3910_v28  ;;  %v2140_v44 = vrot.slane %v2139_v17, 2 }
 0x110   : > { %v2225_v37 = vadd.f32 %v2224_v30, %v2223_v5  ;;  %v1747_v63 = vadd.f32 %v1746_v23, %v1745_v26  ;;  %v2671_v6 = vsel %vm2670_vm6, %v3979_v57, %v2669_v56  ;;  %vm1334_vm0 = vcmp.eq.s32.totalorder %v4197_v13, %v3695_v12 }
 0x111   : > { %v2276_v49 = vadd.f32 %v2275_v55, %v2274_v16  ;;  %v1695_v33 = vadd.f32 %v1694_v27, %v1693_v45  ;;  %v2673_v53 = vsel %vm2672_vm8, %v4053_v40, %v2671_v6  ;;  %v1783_v28 = vrot.slane %v1782_v10, 2  ;;  %v4295_v23 = vpop.permute.xlu1 %1043 }
 0x112   : > { %v2226_v35 = vrot.slane %v2225_v37, 1  ;;  %v1748_v52 = vrot.slane %v1747_v63, 2  ;;  %v2675_v5 = vsel %vm2674_vm10, %v4067_v1, %v2673_v53  ;;  %v3143_v45 = vsel %vm1334_vm0, 1.0, %v5181_v62  ;;  %v4297_v1 = vpop.permute.xlu0 %1036 }
 0x113   : > { %v4286_v57 = vsel %vm2668_vm5, %v2276_v49, %v4202_v8  ;;  %v2677_v26 = vsel %vm2676_vm13, %v1688_v29, %v2675_v5  ;;  %vm1282_vm1 = vcmp.eq.s32.totalorder %v4199_v0, %v3695_v12  ;;  %v4292_v40 = vadd.f32 %v1778_v50, %v1777_v2 }
 0x114   : > { %v2141_v13 = vadd.f32 %v2140_v44, %v2139_v17  ;;  %v2227_v16 = vadd.f32 %v2226_v35, %v2225_v37  ;;  %v2679_v30 = vsel %vm2678_vm14, %v1695_v33, %v2677_v26  ;;  %v2193_v8 = vsel %vm1639_vm11, %v3143_v45, 0.0 }
 0x115   : > { %3236 = vmatprep.mubr.msk.f32.mxu0 %vm2785_vm15, %v2679_v30  ;;  %v3091_v55 = vsel %vm1282_vm1, 1.0, %v5181_v62  ;;  %vm1346_vm2 = vcmp.eq.s32.totalorder %v4222_v31, %v3695_v12  ;;  %vm1339_vm3 = vcmp.eq.s32.totalorder %v4224_v7, %v3695_v12  ;;  %v2190_v0 = vadd.f32 %v2189_v54, %v2188_v58  ;;  %v4316_v54 = vpop.permute.xlu1 %567 }
 0x116   : > { %v4307_v2 = vsel %vm2670_vm6, %v2227_v16, %v2744_v3  ;;  %v1784_v17 = vadd.f32 %v1783_v28, %v1782_v10  ;;  %v2194_v50 = vrot.slane %v2193_v8, 4  ;;  %v1749_v29 = vadd.f32 %v1748_v52, %v1747_v63  ;;  %v4318_v3 = vpop.permute.xlu0 %518 }
 0x117   : > { %v1829_v27 = vsel %vm1639_vm11, %v3091_v55, 0.0  ;;  %v3155_v56 = vsel %vm1346_vm2, 1.0, %v5181_v62  ;;  %v3148_v44 = vsel %vm1339_vm3, 1.0, %v5181_v62  ;;  %v5202_v7 = vrot.slane %v4152_v36, 1 }
 0x118   : > { %v2195_v37 = vadd.f32 %v2194_v50, %v2193_v8  ;;  %v1830_v6 = vrot.slane %v1829_v27, 4  ;;  %v2277_v31 = vsel %vm1639_vm11, %v3155_v56, 0.0  ;;  %v2228_v63 = vsel %vm1639_vm11, %v3148_v44, 0.0 }
 0x119   : > { %v2136_v58 = vadd.f32 %v5202_v7, %v4152_v36  ;;  %v2278_v10 = vrot.slane %v2277_v31, 4  ;;  %v2142_v49 = vrot.slane %v2141_v13, 1  ;;  %v2730_v33 = vsel %vm2668_vm5, %v3940_v25, %v3902_v43  ;;  %v4332_v25 = vpop.permute.xlu1 %644 }
 0x11a   : > { %v2196_v53 = vrot.slane %v2195_v37, 2  ;;  %v1831_v35 = vadd.f32 %v1830_v6, %v1829_v27  ;;  %v2229_v28 = vrot.slane %v2228_v63, 4  ;;  %v2731_v52 = vsel %vm2670_vm6, %v3991_v4, %v2730_v33  ;;  %v4334_v8 = vpop.permute.xlu0 %602 }
 0x11b   : > { %v2279_v5 = vadd.f32 %v2278_v10, %v2277_v31  ;;  %v2143_v36 = vadd.f32 %v2142_v49, %v2141_v13  ;;  %v2732_v26 = vsel %vm2672_vm8, %v4059_v48, %v2731_v52  ;;  %vm1283_vm4 = vcmp.eq.s32.totalorder %v4240_v39, %v3695_v12 }
 0x11c   : > { %v2197_v45 = vadd.f32 %v2196_v53, %v2195_v37  ;;  %v1832_v16 = vrot.slane %v1831_v35, 2  ;;  %v2230_v30 = vadd.f32 %v2229_v28, %v2228_v63  ;;  %v2733_v43 = vsel %vm2674_vm10, %v4095_v11, %v2732_v26  ;;  %v5204_v26 = vld [vmem:[#allocation6_spill] sm:$0xff] }
 0x11d   : > { %v2191_v55 = vrot.slane %v2190_v0, 1  ;;  %v2734_v4 = vsel %vm2676_vm13, %v2136_v58, %v2733_v43  ;;  %v3092_v13 = vsel %vm1283_vm4, 1.0, %v5181_v62  ;;  %vm1276_vm7 = vcmp.eq.s32.totalorder %v4242_v19, %v3695_v12  ;;  %v4351_v58 = vpop.permute.xlu1 %966 }
 0x11e   : > { %v1785_v48 = vrot.slane %v1784_v17, 1  ;;  %v1833_v39 = vadd.f32 %v1832_v16, %v1831_v35  ;;  %v2280_v50 = vrot.slane %v2279_v5, 2  ;;  %v2735_v27 = vsel %vm2678_vm14, %v2143_v36, %v2734_v4 }
 0x11f   : > { %v1750_v56 = vrot.slane %v1749_v29, 1  ;;  %3248 = vmatprep.mubr.msk.f32.mxu1 %vm2785_vm15, %v2735_v27  ;;  %v1836_v11 = vsel %vm1639_vm11, %v3092_v13, 0.0  ;;  %v3085_v44 = vsel %vm1276_vm7, 1.0, %v5181_v62  ;;  %vm1288_vm12 = vcmp.eq.s32.totalorder %v4257_v32, %v3695_v12 }
 0x120   : > { %v5203_v37 = vrot.slane %v4182_v24, 1  ;;  %v2198_v19 = vrot.slane %v2197_v45, 1  ;;  %v2231_v31 = vrot.slane %v2230_v30, 2  ;;  %v1837_v7 = vrot.slane %v1836_v11, 4 }
 0x121   : > { %v1744_v10 = vadd.f32 %v1743_v18, %v4244_v22  ;;  %v4359_v63 = vsel %vm2670_vm6, %v4292_v40, %v4179_v9  ;;  %v3097_v32 = vsel %vm1288_vm12, 1.0, %v5181_v62  ;;  %vm1287_vm0 = vcmp.eq.s32.totalorder %v4259_v14, %v3695_v12  ;;  %v5205_v14 = vld [vmem:[#allocation8_spill] sm:$0xff] }
 0x122   : > { %v4349_v6 = vadd.f32 %v5203_v37, %v4182_v24  ;;  %v4364_v24 = vpop.permute.xlu0 %651  ;;  %v2192_v49 = vadd.f32 %v2191_v55, %v2190_v0  ;;  %v1834_v33 = vrot.slane %v1833_v39, 1  ;;  %v2281_v53 = vadd.f32 %v2280_v50, %v2279_v5  ;;  %v4376_v0 = vpop.permute.xlu1 %1050  ;;  %v5206_v55 = vld [vmem:[#allocation10_spill] sm:$0xff] }
 0x123   : > { %v1787_v35 = vsel %vm1639_vm11, %v3085_v44, 0.0  ;;  %v4367_v28 = vadd.f32 %v1785_v48, %v1784_v17  ;;  %v1751_v22 = vadd.f32 %v1750_v56, %v1749_v29  ;;  %v1871_v18 = vsel %vm1639_vm11, %v3097_v32, 0.0 }
 0x124   : > { %v3096_v9 = vsel %vm1287_vm0, 1.0, %v5181_v62  ;;  %v2199_v40 = vadd.f32 %v2198_v19, %v2197_v45  ;;  %v4371_v52 = vadd.f32 %v2231_v31, %v2230_v30  ;;  %v1838_v36 = vadd.f32 %v1837_v7, %v1836_v11 }
 0x125   : > { %v2682_v16 = vsel %vm2670_vm6, %v5205_v14, %v5204_v26  ;;  %v1788_v5 = vrot.slane %v1787_v35, 4  ;;  %v1872_v43 = vrot.slane %v1871_v18, 4  ;;  %v1864_v17 = vsel %vm1639_vm11, %v3096_v9, 0.0  ;;  %v5208_v26 = vld [vmem:[#allocation9_spill] sm:$0xff] }
 0x126   : > { %v2683_v29 = vsel %vm2672_vm8, %v5206_v55, %v2682_v16  ;;  %v4381_v4 = vpop.permute.xlu0 %1015  ;;  %v1835_v13 = vadd.f32 %v1834_v33, %v1833_v39  ;;  %v2282_v45 = vrot.slane %v2281_v53, 1  ;;  %v1865_v30 = vrot.slane %v1864_v17, 4  ;;  %v4392_v31 = vpop.permute.xlu1 %1099 }
 0x127   : > { %v2684_v48 = vsel %vm2674_vm10, %v4164_v42, %v2683_v29  ;;  %v1873_v50 = vadd.f32 %v1872_v43, %v1871_v18  ;;  %v1139_v56 = vrot.slane %v3733_v47, %v3634_v59  ;;  %v775_v11 = vrot.slane %v3780_v15, %v3550_v51 }
 0x128   : > { %v2685_v27 = vsel %vm2676_vm13, %v1744_v10, %v2684_v48  ;;  %v2233_v44 = vrot.slane %v4371_v52, 1  ;;  %v1839_v37 = vrot.slane %v1838_v36, 2  ;;  %v1866_v19 = vadd.f32 %v1865_v30, %v1864_v17 }
 0x129   : > { %v2686_v39 = vsel %vm2678_vm14, %v1751_v22, %v2685_v27  ;;  %v1789_v7 = vadd.f32 %v1788_v5, %v1787_v35  ;;  %v1874_v32 = vrot.slane %v1873_v50, 2  ;;  %1141 = vbcast.lane.b32.xlu1 %v1139_v56, 256  ;;  %vm1347_vm1 = vcmp.eq.s32.totalorder %v4274_v46, %v3695_v12  ;;  %777 = vbcast.lane.b32.xlu0 %v775_v11, 256  ;;  %v5207_v46 = vld [vmem:[#allocation7_spill] sm:$0xff] }
 0x12a   : > { %3237 = vmatmul.mubr.msk.f32.vlgmr.msra.gmra.mrb[0].mxu0 %vm2785_vm15, %v2686_v39  ;;  %vm1340_vm2 = vcmp.eq.s32.totalorder %v4276_v38, %v3695_v12  ;;  %v4399_v47 = vpop.permute.xlu0 %1092  ;;  %v4403_v42 = vsel %vm2670_vm6, %v1835_v13, %v4264_v34  ;;  %v2283_v10 = vadd.f32 %v2282_v45, %v2281_v53  ;;  %v1867_v33 = vrot.slane %v1866_v19, 2  ;;  %v5209_v34 = vld [vmem:[#allocation11_spill] sm:$0xff]  ;;  %v4414_v43 = vpop.permute.xlu1 %574 }
 0x12b   : > { %v3156_v35 = vsel %vm1347_vm1, 1.0, %v5181_v62  ;;  %v1875_v22 = vadd.f32 %v1874_v32, %v1873_v50  ;;  %v3149_v9 = vsel %vm1340_vm2, 1.0, %v5181_v62  ;;  %v2738_v38 = vsel %vm2670_vm6, %v5208_v26, %v5207_v46 }
 0x12c   : > { %v2284_v18 = vsel %vm1639_vm11, %v3156_v35, 0.0  ;;  %v1840_v14 = vadd.f32 %v1839_v37, %v1838_v36  ;;  %v1868_v16 = vadd.f32 %v1867_v33, %v1866_v19  ;;  %v2235_v5 = vsel %vm1639_vm11, %v3149_v9, 0.0 }
 0x12d   : > { %v2739_v53 = vsel %vm2672_vm8, %v5209_v34, %v2738_v38  ;;  %v1790_v17 = vrot.slane %v1789_v7, 2  ;;  %v1876_v55 = vrot.slane %v1875_v22, 1  ;;  %v1223_v13 = vrot.slane %v3812_v21, %v3550_v51 }
 0x12e   : > { %v2740_v29 = vsel %vm2674_vm10, %v4349_v6, %v2739_v53  ;;  %v4420_v45 = vpop.permute.xlu0 %525  ;;  %v1869_v30 = vrot.slane %v1868_v16, 1  ;;  %v2285_v36 = vrot.slane %v2284_v18, 4  ;;  %v1174_v50 = vrot.slane %v3765_v20, %v3564_v61 }
 0x12f   : > { %v2741_v48 = vsel %vm2676_vm13, %v2192_v49, %v2740_v29  ;;  %v1877_v27 = vadd.f32 %v1876_v55, %v1875_v22  ;;  %v2236_v56 = vrot.slane %v2235_v5, 4  ;;  %1225 = vbcast.lane.b32.xlu1 %v1223_v13, 256  ;;  %vm1352_vm3 = vcmp.eq.s32.totalorder %v4295_v23, %v3695_v12  ;;  %v4432_v49 = vpop.permute.xlu1 %658 }
 0x130   : > { %v2742_v11 = vsel %vm2678_vm14, %v2199_v40, %v2741_v48  ;;  %v1841_v6 = vrot.slane %v1840_v14, 1  ;;  %v1870_v37 = vadd.f32 %v1869_v30, %v1868_v16  ;;  %1176 = vbcast.lane.b32.xlu0 %v1174_v50, 256  ;;  %v3161_v51 = vsel %vm1352_vm3, 1.0, %v5181_v62 }
 0x131   : > { %3249 = vmatmul.mubr.msk.f32.vlgmr.msra.gmra.mrb[0].mxu1 %vm2785_vm15, %v2742_v11  ;;  %vm1351_vm4 = vcmp.eq.s32.totalorder %v4297_v1, %v3695_v12  ;;  %v1791_v19 = vadd.f32 %v1790_v17, %v1789_v7  ;;  %v2319_v39 = vsel %vm1639_vm11, %v3161_v51, 0.0  ;;  %v782_v23 = vrot.slane %v3780_v15, %v3564_v61  ;;  %v5210_v7 = vld [vmem:[#allocation5_spill] sm:$0xff] }
 0x132   : > { %v3160_v40 = vsel %vm1351_vm4, 1.0, %v5181_v62  ;;  %v4438_v32 = vpop.permute.xlu0 %609  ;;  %v4441_v33 = vsel %vm2666_vm9, %v1877_v27, %v1870_v37  ;;  %v2286_v35 = vadd.f32 %v2285_v36, %v2284_v18  ;;  %v2320_v22 = vrot.slane %v2319_v39, 4 }
 0x133   : > { %v2312_v9 = vsel %vm1639_vm11, %v3160_v40, 0.0  ;;  %v2237_v1 = vadd.f32 %v2236_v56, %v2235_v5  ;;  %784 = vbcast.lane.b32.xlu1 %v782_v23, 256  ;;  %v733_v26 = vrot.slane %v3751_v60, %v5210_v7  ;;  %vm1284_vm7 = vcmp.eq.s32.totalorder %v4316_v54, %v3695_v12  ;;  %v4460_v54 = vpop.permute.xlu1 %1022 }
 0x134   : > { %v2313_v46 = vrot.slane %v2312_v9, 4  ;;  %v4449_v38 = vadd.f32 %v2233_v44, %v4371_v52  ;;  %v2321_v16 = vadd.f32 %v2320_v22, %v2319_v39  ;;  %v3093_v34 = vsel %vm1284_vm7, 1.0, %v5181_v62 }
 0x135   : > { %vm1277_vm12 = vcmp.eq.s32.totalorder %v4318_v3, %v3695_v12  ;;  %v4456_v18 = vsel %vm2670_vm6, %v2283_v10, %v4286_v57  ;;  %735 = vbcast.lane.b32.xlu0 %v733_v26, 256  ;;  %v1843_v53 = vsel %vm1639_vm11, %v3093_v34, 0.0  ;;  %v4464_v44 = vadd.f32 %v1841_v6, %v1840_v14 }
 0x136   : > { %v2314_v5 = vadd.f32 %v2313_v46, %v2312_v9  ;;  %v3086_v17 = vsel %vm1277_vm12, 1.0, %v5181_v62  ;;  %v4462_v52 = vpop.permute.xlu0 %973  ;;  %v2287_v55 = vrot.slane %v2286_v35, 2  ;;  %v2322_v29 = vrot.slane %v2321_v16, 2 }
 0x137   : > { %v1794_v3 = vsel %vm1639_vm11, %v3086_v17, 0.0  ;;  %v1792_v13 = vrot.slane %v1791_v19, 1  ;;  %v2238_v30 = vrot.slane %v2237_v1, 2  ;;  %v1230_v10 = vrot.slane %v3812_v21, %v3564_v61  ;;  %v4479_v23 = vpop.permute.xlu1 %1106 }
 0x138   : > { %v2315_v57 = vrot.slane %v2314_v5, 2  ;;  %v2323_v36 = vadd.f32 %v2322_v29, %v2321_v16  ;;  %v1844_v48 = vrot.slane %v1843_v53, 4  ;;  %v1181_v50 = vrot.slane %v3765_v20, %v5210_v7 }
 0x139   : > { %vm1295_vm0 = vcmp.eq.s32.totalorder %v4332_v25, %v3695_v12  ;;  %v1795_v27 = vrot.slane %v1794_v3, 4  ;;  %1232 = vbcast.lane.b32.xlu1 %v1230_v10, 256  ;;  %vm1289_vm1 = vcmp.eq.s32.totalorder %v4334_v8, %v3695_v12  ;;  %v2288_v11 = vadd.f32 %v2287_v55, %v2286_v35 }
 0x13a   : > { %v2316_v14 = vadd.f32 %v2315_v57, %v2314_v5  ;;  %v3104_v56 = vsel %vm1295_vm0, 1.0, %v5181_v62  ;;  %v2324_v6 = vrot.slane %v2323_v36, 1  ;;  %1183 = vbcast.lane.b32.xlu0 %v1181_v50, 256  ;;  %v3098_v37 = vsel %vm1289_vm1, 1.0, %v5181_v62  ;;  %v4481_v22 = vpop.permute.xlu0 %1057 }
 0x13b   : > { %v1920_v61 = vsel %vm1639_vm11, %v3104_v56, 0.0  ;;  %v2239_v51 = vadd.f32 %v2238_v30, %v2237_v1  ;;  %v1878_v25 = vsel %vm1639_vm11, %v3098_v37, 0.0  ;;  %v1845_v46 = vadd.f32 %v1844_v48, %v1843_v53 }
 0x13c   : > { %v2317_v39 = vrot.slane %v2316_v14, 1  ;;  %v1921_v40 = vrot.slane %v1920_v61, 4  ;;  %v2325_v9 = vadd.f32 %v2324_v6, %v2323_v36  ;;  %v1879_v26 = vrot.slane %v1878_v25, 4 }
 0x13d   : > { %v789_v8 = vrot.slane %v3780_v15, %v5210_v7  ;;  %v1796_v16 = vadd.f32 %v1795_v27, %v1794_v3  ;;  %v740_v1 = vrot.slane %v3751_v60, %v3607_v41  ;;  %v4487_v5 = vadd.f32 %v1792_v13, %v1791_v19 }
 0x13e   : > { %v2318_v35 = vadd.f32 %v2317_v39, %v2316_v14  ;;  %v1922_v34 = vadd.f32 %v1921_v40, %v1920_v61  ;;  %v1880_v17 = vadd.f32 %v1879_v26, %v1878_v25  ;;  %vm1341_vm2 = vcmp.eq.s32.totalorder %v4351_v58, %v3695_v12  ;;  %v4502_v50 = vpop.permute.xlu0 %581 }
 0x13f   : > { %791 = vbcast.lane.b32.xlu1 %v789_v8, 256  ;;  %vm1296_vm3 = vcmp.eq.s32.totalorder %v4364_v24, %v3695_v12  ;;  %v2289_v53 = vrot.slane %v2288_v11, 1  ;;  %742 = vbcast.lane.b32.xlu0 %v740_v1, 256  ;;  %v3150_v3 = vsel %vm1341_vm2, 1.0, %v5181_v62  ;;  %v1846_v30 = vrot.slane %v1845_v46, 2  ;;  %v4500_v24 = vpop.permute.xlu1 %616 }
 0x140   : > { %v4494_v55 = vsel %vm2666_vm9, %v2325_v9, %v2318_v35  ;;  %v1923_v29 = vrot.slane %v1922_v34, 2  ;;  %v1881_v57 = vrot.slane %v1880_v17, 2  ;;  %v2242_v19 = vsel %vm1639_vm11, %v3150_v3, 0.0 }
 0x141   : > { %v3105_v13 = vsel %vm1296_vm3, 1.0, %v5181_v62  ;;  %v2240_v10 = vrot.slane %v2239_v51, 1  ;;  %v1797_v36 = vrot.slane %v1796_v16, 2  ;;  %v1237_v56 = vrot.slane %v3812_v21, %v5210_v7 }
 0x142   : > { %v1924_v58 = vadd.f32 %v1923_v29, %v1922_v34  ;;  %v1927_v48 = vsel %vm1639_vm11, %v3105_v13, 0.0  ;;  %v1882_v14 = vadd.f32 %v1881_v57, %v1880_v17  ;;  %v1188_v6 = vrot.slane %v3765_v20, %v3607_v41 }
 0x143   : > { %v1928_v27 = vrot.slane %v1927_v48, 4  ;;  %v4508_v61 = vadd.f32 %v2289_v53, %v2288_v11  ;;  %v2243_v37 = vrot.slane %v2242_v19, 4  ;;  %vm1353_vm4 = vcmp.eq.s32.totalorder %v4376_v0, %v3695_v12  ;;  %1239 = vbcast.lane.b32.xlu1 %v1237_v56, 256 }
 0x144   : > { %vm1348_vm7 = vcmp.eq.s32.totalorder %v4381_v4, %v3695_v12  ;;  %v4514_v39 = vadd.f32 %v1846_v30, %v1845_v46  ;;  %v1883_v40 = vrot.slane %v1882_v14, 1  ;;  %1190 = vbcast.lane.b32.xlu0 %v1188_v6, 256  ;;  %v3162_v7 = vsel %vm1353_vm4, 1.0, %v5181_v62 }
 0x145   : > { %v1929_v25 = vadd.f32 %v1928_v27, %v1927_v48  ;;  %v4517_v9 = vadd.f32 %v2240_v10, %v2239_v51  ;;  %v4519_v26 = vadd.f32 %v1797_v36, %v1796_v16  ;;  %v1925_v11 = vrot.slane %v1924_v58, 1  ;;  %v4529_v51 = vpop.permute.xlu1 %1029  ;;  %v4531_v16 = vpop.permute.xlu0 %665 }
 0x146   : > { %v2326_v8 = vsel %vm1639_vm11, %v3162_v7, 0.0  ;;  %v1884_v35 = vadd.f32 %v1883_v40, %v1882_v14  ;;  %v3157_v4 = vsel %vm1348_vm7, 1.0, %v5181_v62  ;;  %v2244_v46 = vadd.f32 %v2243_v37, %v2242_v19 }
 0x147   : > { %v1930_v0 = vrot.slane %v1929_v25, 2  ;;  %v2327_v34 = vrot.slane %v2326_v8, 4  ;;  %v796_v1 = vrot.slane %v3780_v15, %v3607_v41  ;;  %v747_v17 = vrot.slane %v3751_v60, %v3634_v59 }
 0x148   : > { %vm1360_vm12 = vcmp.eq.s32.totalorder %v4392_v31, %v3695_v12  ;;  %v1848_v53 = vrot.slane %v4514_v39, 1  ;;  %v4536_v29 = vsel %vm2668_vm5, %v1884_v35, %v4441_v33  ;;  %v2291_v57 = vsel %vm1639_vm11, %v3157_v4, 0.0 }
 0x149   : > { %v1931_v3 = vadd.f32 %v1930_v0, %v1929_v25  ;;  %v2328_v30 = vadd.f32 %v2327_v34, %v2326_v8  ;;  %798 = vbcast.lane.b32.xlu1 %v796_v1, 256  ;;  %749 = vbcast.lane.b32.xlu0 %v747_v17, 256  ;;  %v3169_v60 = vsel %vm1360_vm12, 1.0, %v5181_v62  ;;  %vm1359_vm0 = vcmp.eq.s32.totalorder %v4399_v47, %v3695_v12 }
 0x14a   : > { %v1244_v31 = vrot.slane %v3812_v21, %v3607_v41  ;;  %v1926_v19 = vadd.f32 %v1925_v11, %v1924_v58  ;;  %v2375_v33 = vsel %vm1639_vm11, %v3169_v60, 0.0  ;;  %v2245_v36 = vrot.slane %v2244_v46, 2  ;;  %v4553_v41 = vpop.permute.xlu1 %1113  ;;  %v4555_v58 = vpop.permute.xlu0 %1064 }
 0x14b   : > { %v1932_v13 = vrot.slane %v1931_v3, 1  ;;  %v2329_v10 = vrot.slane %v2328_v30, 2  ;;  %v2376_v48 = vrot.slane %v2375_v33, 4  ;;  %v3168_v14 = vsel %vm1359_vm0, 1.0, %v5181_v62 }
 0x14c   : > { %v1195_v27 = vrot.slane %v3765_v20, %v3634_v59  ;;  %v2292_v37 = vrot.slane %v2291_v57, 4  ;;  %v2368_v47 = vsel %vm1639_vm11, %v3168_v14, 0.0  ;;  %vm1285_vm1 = vcmp.eq.s32.totalorder %v4414_v43, %v3695_v12 }
 0x14d   : > { %v1933_v56 = vadd.f32 %v1932_v13, %v1931_v3  ;;  %v2330_v6 = vadd.f32 %v2329_v10, %v2328_v30  ;;  %v2377_v40 = vadd.f32 %v2376_v48, %v2375_v33  ;;  %v2369_v25 = vrot.slane %v2368_v47, 4  ;;  %1246 = vbcast.lane.b32.xlu1 %v1244_v31, 256 }
 0x14e   : > { %1197 = vbcast.lane.b32.xlu0 %v1195_v27, 256  ;;  %vm1278_vm2 = vcmp.eq.s32.totalorder %v4420_v45, %v3695_v12  ;;  %v1799_v20 = vrot.slane %v4519_v26, 1  ;;  %v3094_v8 = vsel %vm1285_vm1, 1.0, %v5181_v62  ;;  %v2246_v4 = vadd.f32 %v2245_v36, %v2244_v46  ;;  %v4576_v48 = vpop.permute.xlu1 %672 }
 0x14f   : > { %v4559_v7 = vsel %vm2666_vm9, %v1933_v56, %v1926_v19  ;;  %v2331_v11 = vrot.slane %v2330_v6, 1  ;;  %v2378_v35 = vrot.slane %v2377_v40, 2  ;;  %v2370_v0 = vadd.f32 %v2369_v25, %v2368_v47 }
 0x150   : > { %v1850_v34 = vsel %vm1639_vm11, %v3094_v8, 0.0  ;;  %v3087_v43 = vsel %vm1278_vm2, 1.0, %v5181_v62  ;;  %v2293_v1 = vadd.f32 %v2292_v37, %v2291_v57  ;;  %v1251_v31 = vrot.slane %v3812_v21, %v3634_v59  ;;  %v4578_v21 = vpop.permute.xlu0 %623 }
 0x151   : > { %v2332_v45 = vadd.f32 %v2331_v11, %v2330_v6  ;;  %v1801_v17 = vsel %vm1639_vm11, %v3087_v43, 0.0  ;;  %v2379_v3 = vadd.f32 %v2378_v35, %v2377_v40  ;;  %v2371_v30 = vrot.slane %v2370_v0, 2 }
 0x152   : > { %v1802_v60 = vrot.slane %v1801_v17, 4  ;;  %v1851_v13 = vrot.slane %v1850_v34, 4  ;;  %v803_v10 = vrot.slane %v3780_v15, %v3634_v59  ;;  %vm1297_vm3 = vcmp.eq.s32.totalorder %v4432_v49, %v3695_v12  ;;  %1253 = vbcast.lane.b32.xlu1 %v1251_v31, 256 }
 0x153   : > { %v4569_v19 = vsel %vm2668_vm5, %v2332_v45, %v4494_v55  ;;  %v2380_v46 = vrot.slane %v2379_v3, 1  ;;  %v2372_v57 = vadd.f32 %v2371_v30, %v2370_v0  ;;  %v3106_v36 = vsel %vm1297_vm3, 1.0, %v5181_v62  ;;  %v4606_v45 = vpop.permute.xlu1 %707 }
 0x154   : > { %v1803_v33 = vadd.f32 %v1802_v60, %v1801_v17  ;;  %v2247_v14 = vrot.slane %v2246_v4, 1  ;;  %805 = vbcast.lane.b32.xlu0 %v803_v10, 256  ;;  %v1934_v55 = vsel %vm1639_vm11, %v3106_v36, 0.0  ;;  %vm1290_vm4 = vcmp.eq.s32.totalorder %v4438_v32, %v3695_v12  ;;  %v4608_v17 = vpop.permute.xlu0 %700 }
 0x155   : > { %vm1349_vm7 = vcmp.eq.s32.totalorder %v4460_v54, %v3695_v12  ;;  %v2294_v59 = vrot.slane %v2293_v1, 2  ;;  %v2381_v15 = vadd.f32 %v2380_v46, %v2379_v3  ;;  %v2373_v49 = vrot.slane %v2372_v57, 1 }
 0x156   : > { %v1935_v27 = vrot.slane %v1934_v55, 4  ;;  %v1852_v56 = vadd.f32 %v1851_v13, %v1850_v34  ;;  %v1804_v6 = vrot.slane %v1803_v33, 2  ;;  %v3099_v37 = vsel %vm1290_vm4, 1.0, %v5181_v62 }
 0x157   : > { %vm1342_vm12 = vcmp.eq.s32.totalorder %v4462_v52, %v3695_v12  ;;  %v2374_v47 = vadd.f32 %v2373_v49, %v2372_v57  ;;  %v1885_v25 = vsel %vm1639_vm11, %v3099_v37, 0.0  ;;  %v3158_v32 = vsel %vm1349_vm7, 1.0, %v5181_v62 }
 0x158   : > { %v1936_v40 = vadd.f32 %v1935_v27, %v1934_v55  ;;  %v4593_v54 = vadd.f32 %v1848_v53, %v4514_v39  ;;  %v4596_v11 = vadd.f32 %v1799_v20, %v4519_v26  ;;  %v1886_v8 = vrot.slane %v1885_v25, 4 }
 0x159   : > { %v3151_v35 = vsel %vm1342_vm12, 1.0, %v5181_v62  ;;  %v4599_v0 = vadd.f32 %v2247_v14, %v2246_v4  ;;  %v4601_v52 = vadd.f32 %v2294_v59, %v2293_v1  ;;  %v4604_v34 = vsel %vm2666_vm9, %v2381_v15, %v2374_v47  ;;  %v4625_v15 = vpop.permute.xlu1 %1120 }
 0x15a   : > { %v1937_v43 = vrot.slane %v1936_v40, 2  ;;  %v1887_v39 = vadd.f32 %v1886_v8, %v1885_v25  ;;  %v2298_v53 = vsel %vm1639_vm11, %v3158_v32, 0.0  ;;  %v2249_v26 = vsel %vm1639_vm11, %v3151_v35, 0.0 }
 0x15b   : > { %vm1361_vm0 = vcmp.eq.s32.totalorder %v4479_v23, %v3695_v12  ;;  %v1853_v20 = vrot.slane %v1852_v56, 2  ;;  %v1805_v4 = vadd.f32 %v1804_v6, %v1803_v33  ;;  %v2250_v3 = vrot.slane %v2249_v26, 4 }
 0x15c   : > { %v1938_v1 = vadd.f32 %v1937_v43, %v1936_v40  ;;  %v1888_v30 = vrot.slane %v1887_v39, 2  ;;  %v3170_v60 = vsel %vm1361_vm0, 1.0, %v5181_v62  ;;  %vm1354_vm1 = vcmp.eq.s32.totalorder %v4481_v22, %v3695_v12 }
 0x15d   : > { %vm1291_vm2 = vcmp.eq.s32.totalorder %v4500_v24, %v3695_v12  ;;  %v2299_v13 = vrot.slane %v2298_v53, 4  ;;  %v2251_v10 = vadd.f32 %v2250_v3, %v2249_v26  ;;  %v2382_v46 = vsel %vm1639_vm11, %v3170_v60, 0.0  ;;  %v4627_v24 = vpop.permute.xlu0 %1071 }
 0x15e   : > { %v1939_v31 = vrot.slane %v1938_v1, 1  ;;  %v1889_v57 = vadd.f32 %v1888_v30, %v1887_v39  ;;  %v2383_v23 = vrot.slane %v2382_v46, 4  ;;  %v3163_v33 = vsel %vm1354_vm1, 1.0, %v5181_v62 }
 0x15f   : > { %v3100_v36 = vsel %vm1291_vm2, 1.0, %v5181_v62  ;;  %v4622_v14 = vadd.f32 %v1853_v20, %v1852_v56  ;;  %v1806_v55 = vrot.slane %v1805_v4, 1  ;;  %v2333_v22 = vsel %vm1639_vm11, %v3163_v33, 0.0 }
 0x160   : > { %v1940_v59 = vadd.f32 %v1939_v31, %v1938_v1  ;;  %v1890_v49 = vrot.slane %v1889_v57, 1  ;;  %v2384_v27 = vadd.f32 %v2383_v23, %v2382_v46  ;;  %v2334_v6 = vrot.slane %v2333_v22, 4 }
 0x161   : > { %v1892_v37 = vsel %vm1639_vm11, %v3100_v36, 0.0  ;;  %v2296_v47 = vrot.slane %v4601_v52, 1  ;;  %v2300_v56 = vadd.f32 %v2299_v13, %v2298_v53  ;;  %v2252_v25 = vrot.slane %v2251_v10, 2  ;;  %v4647_v13 = vpop.permute.xlu1 %1155 }
 0x162   : > { %v4633_v40 = vsel %vm2668_vm5, %v1940_v59, %v4559_v7  ;;  %v1891_v32 = vadd.f32 %v1890_v49, %v1889_v57  ;;  %v2385_v8 = vrot.slane %v2384_v27, 2  ;;  %v2335_v35 = vadd.f32 %v2334_v6, %v2333_v22 }
 0x163   : > { %vm1286_vm3 = vcmp.eq.s32.totalorder %v4502_v50, %v3695_v12  ;;  %v1855_v43 = vrot.slane %v4622_v14, 1  ;;  %v1807_v39 = vadd.f32 %v1806_v55, %v1805_v4  ;;  %v1893_v26 = vrot.slane %v1892_v37, 4  ;;  %v4649_v4 = vpop.permute.xlu0 %1148 }
 0x164   : > { %v3095_v20 = vsel %vm1286_vm3, 1.0, %v5181_v62  ;;  %v4641_v1 = vsel %vm2670_vm6, %v1891_v32, %v4536_v29  ;;  %v2386_v7 = vadd.f32 %v2385_v8, %v2384_v27  ;;  %v2336_v3 = vrot.slane %v2335_v35, 2 }
 0x165   : > { %v1857_v53 = vsel %vm1639_vm11, %v3095_v20, 0.0  ;;  %v2301_v30 = vrot.slane %v2300_v56, 2  ;;  %v2253_v60 = vadd.f32 %v2252_v25, %v2251_v10  ;;  %v2690_v50 = vsel %vm2672_vm8, %v4367_v28, %v4359_v63  ;;  %v4673_v32 = vpop.permute.xlu1 %679 }
 0x166   : > { %v1858_v31 = vrot.slane %v1857_v53, 4  ;;  %v2387_v46 = vrot.slane %v2386_v7, 1  ;;  %v2337_v57 = vadd.f32 %v2336_v3, %v2335_v35  ;;  %v2691_v29 = vsel %vm2674_vm10, %v4487_v5, %v2690_v50 }
 0x167   : > { %vm1350_vm4 = vcmp.eq.s32.totalorder %v4529_v51, %v3695_v12  ;;  %v1894_v23 = vadd.f32 %v1893_v26, %v1892_v37  ;;  %v2692_v10 = vsel %vm2676_vm13, %v4596_v11, %v2691_v29  ;;  %v4660_v22 = vadd.f32 %v2301_v30, %v2300_v56  ;;  %v4675_v8 = vpop.permute.xlu0 %630 }
 0x168   : > { %v1859_v33 = vadd.f32 %v1858_v31, %v1857_v53  ;;  %v3159_v36 = vsel %vm1350_vm4, 1.0, %v5181_v62  ;;  %v2388_v63 = vadd.f32 %v2387_v46, %v2386_v7  ;;  %v2338_v28 = vrot.slane %v2337_v57, 1 }
 0x169   : > { %v2693_v55 = vsel %vm2678_vm14, %v1807_v39, %v2692_v10  ;;  %v2305_v59 = vsel %vm1639_vm11, %v3159_v36, 0.0  ;;  %v2254_v49 = vrot.slane %v2253_v60, 1  ;;  %vm1298_vm7 = vcmp.eq.s32.totalorder %v4531_v16, %v3695_v12 }
 0x16a   : > { %3239 = vmatprep.mubr.msk.f32.mxu0 %vm2785_vm15, %v2693_v55  ;;  %v2306_v5 = vrot.slane %v2305_v59, 4  ;;  %v4667_v51 = vsel %vm2668_vm5, %v2388_v63, %v4604_v34  ;;  %v2339_v11 = vadd.f32 %v2338_v28, %v2337_v57  ;;  %v3107_v27 = vsel %vm1298_vm7, 1.0, %v5181_v62 }
 0x16b   : > { %vm1362_vm12 = vcmp.eq.s32.totalorder %v4553_v41, %v3695_v12  ;;  %v1895_v6 = vrot.slane %v1894_v23, 2  ;;  %v1860_v37 = vrot.slane %v1859_v33, 2  ;;  %v1941_v25 = vsel %vm1639_vm11, %v3107_v27, 0.0 }
 0x16c   : > { %v2307_v56 = vadd.f32 %v2306_v5, %v2305_v59  ;;  %v4679_v16 = vsel %vm2670_vm6, %v2339_v11, %v4569_v19  ;;  %v1942_v34 = vrot.slane %v1941_v25, 4  ;;  %v3171_v35 = vsel %vm1362_vm12, 1.0, %v5181_v62 }
 0x16d   : > { %vm1355_vm0 = vcmp.eq.s32.totalorder %v4555_v58, %v3695_v12  ;;  %v2255_v41 = vadd.f32 %v2254_v49, %v2253_v60  ;;  %v2389_v26 = vsel %vm1639_vm11, %v3171_v35, 0.0  ;;  %v2746_v19 = vsel %vm2672_vm8, %v4449_v38, %v4307_v2  ;;  %v4698_v38 = vpop.permute.xlu1 %756 }
 0x16e   : > { %v2308_v39 = vrot.slane %v2307_v56, 2  ;;  %v3164_v20 = vsel %vm1355_vm0, 1.0, %v5181_v62  ;;  %v1943_v7 = vadd.f32 %v1942_v34, %v1941_v25  ;;  %v2390_v3 = vrot.slane %v2389_v26, 4 }
 0x16f   : > { %v2340_v53 = vsel %vm1639_vm11, %v3164_v20, 0.0  ;;  %v1896_v30 = vadd.f32 %v1895_v6, %v1894_v23  ;;  %v1861_v31 = vadd.f32 %v1860_v37, %v1859_v33  ;;  %v2747_v58 = vsel %vm2674_vm10, %v4517_v9, %v2746_v19  ;;  %v4700_v23 = vpop.permute.xlu0 %714 }
 0x170   : > { %v2341_v50 = vrot.slane %v2340_v53, 4  ;;  %v1944_v60 = vrot.slane %v1943_v7, 2  ;;  %v2391_v46 = vadd.f32 %v2390_v3, %v2389_v26  ;;  %v2748_v57 = vsel %vm2676_vm13, %v4599_v0, %v2747_v58 }
 0x171   : > { %vm1299_vm1 = vcmp.eq.s32.totalorder %v4576_v48, %v3695_v12  ;;  %v2309_v29 = vadd.f32 %v2308_v39, %v2307_v56  ;;  %v2749_v36 = vsel %vm2678_vm14, %v2255_v41, %v2748_v57  ;;  %vm1292_vm2 = vcmp.eq.s32.totalorder %v4578_v21, %v3695_v12  ;;  %v4721_v39 = vpop.permute.xlu1 %1078 }
 0x172   : > { %v2342_v10 = vadd.f32 %v2341_v50, %v2340_v53  ;;  %v3108_v2 = vsel %vm1299_vm1, 1.0, %v5181_v62  ;;  %v1945_v33 = vadd.f32 %v1944_v60, %v1943_v7  ;;  %v2392_v9 = vrot.slane %v2391_v46, 2  ;;  %3251 = vmatprep.mubr.msk.f32.mxu1 %vm2785_vm15, %v2749_v36 }
 0x173   : > { %v1948_v63 = vsel %vm1639_vm11, %v3108_v2, 0.0  ;;  %v2303_v48 = vrot.slane %v4660_v22, 1  ;;  %v3101_v55 = vsel %vm1292_vm2, 1.0, %v5181_v62  ;;  %v1897_v59 = vrot.slane %v1896_v30, 1  ;;  %v4723_v26 = vpop.permute.xlu0 %763 }
 0x174   : > { %v2343_v0 = vrot.slane %v2342_v10, 2  ;;  %v1949_v28 = vrot.slane %v1948_v63, 4  ;;  %v1946_v49 = vrot.slane %v1945_v33, 1  ;;  %v1899_v5 = vsel %vm1639_vm11, %v3101_v55, 0.0 }
 0x175   : > { %vm1304_vm3 = vcmp.eq.s32.totalorder %v4606_v45, %v3695_v12  ;;  %v1862_v11 = vrot.slane %v1861_v31, 1  ;;  %v2310_v27 = vrot.slane %v2309_v29, 1  ;;  %v2393_v6 = vadd.f32 %v2392_v9, %v2391_v46  ;;  %v4747_v2 = vpop.permute.xlu1 %1162 }
 0x176   : > { %v3113_v37 = vsel %vm1304_vm3, 1.0, %v5181_v62  ;;  %v2344_v56 = vadd.f32 %v2343_v0, %v2342_v10  ;;  %v1950_v21 = vadd.f32 %v1949_v28, %v1948_v63  ;;  %vm1303_vm4 = vcmp.eq.s32.totalorder %v4608_v17, %v3695_v12 }
 0x177   : > { %v1983_v25 = vsel %vm1639_vm11, %v3113_v37, 0.0  ;;  %v2297_v34 = vadd.f32 %v2296_v47, %v4601_v52  ;;  %v1856_v45 = vadd.f32 %v1855_v43, %v4622_v14  ;;  %v1900_v35 = vrot.slane %v1899_v5, 4 }
 0x178   : > { %v1984_v41 = vrot.slane %v1983_v25, 4  ;;  %v2304_v20 = vadd.f32 %v2303_v48, %v4660_v22  ;;  %v4726_v7 = vadd.f32 %v1897_v59, %v1896_v30  ;;  %v1947_v3 = vadd.f32 %v1946_v49, %v1945_v33 }
 0x179   : > { %v3112_v17 = vsel %vm1303_vm4, 1.0, %v5181_v62  ;;  %v1863_v53 = vadd.f32 %v1862_v11, %v1861_v31  ;;  %v2311_v19 = vadd.f32 %v2310_v27, %v2309_v29  ;;  %v2394_v52 = vrot.slane %v2393_v6, 1  ;;  %v4774_v37 = vpop.permute.xlu1 %1211 }
 0x17a   : > { %v1985_v47 = vadd.f32 %v1984_v41, %v1983_v25  ;;  %v2345_v50 = vrot.slane %v2344_v56, 1  ;;  %v1951_v58 = vrot.slane %v1950_v21, 2  ;;  %v1976_v14 = vsel %vm1639_vm11, %v3112_v17, 0.0 }
 0x17b   : > { %vm1363_vm7 = vcmp.eq.s32.totalorder %v4625_v15, %v3695_v12  ;;  %v4732_v43 = vadd.f32 %v1900_v35, %v1899_v5  ;;  %v1977_v22 = vrot.slane %v1976_v14, 4  ;;  %v2697_v30 = vsel %vm2672_vm8, %v4464_v44, %v4403_v42  ;;  %v4749_v42 = vpop.permute.xlu0 %1127 }
 0x17c   : > { %v1986_v60 = vrot.slane %v1985_v47, 2  ;;  %v4739_v31 = vsel %vm2670_vm6, %v1947_v3, %v4633_v40  ;;  %v2698_v46 = vsel %vm2674_vm10, %v4593_v54, %v2697_v30  ;;  %v3172_v57 = vsel %vm1363_vm7, 1.0, %v5181_v62 }
 0x17d   : > { %vm1356_vm12 = vcmp.eq.s32.totalorder %v4627_v24, %v3695_v12  ;;  %v2395_v15 = vadd.f32 %v2394_v52, %v2393_v6  ;;  %v1978_v10 = vadd.f32 %v1977_v22, %v1976_v14  ;;  %v2699_v36 = vsel %vm2676_vm13, %v1856_v45, %v2698_v46  ;;  %v4797_v46 = vpop.permute.xlu1 %686 }
 0x17e   : > { %v1987_v29 = vadd.f32 %v1986_v60, %v1985_v47  ;;  %v4751_v44 = vadd.f32 %v2345_v50, %v2344_v56  ;;  %v2700_v40 = vsel %vm2678_vm14, %v1863_v53, %v2699_v36  ;;  %v2396_v54 = vsel %vm1639_vm11, %v3172_v57, 0.0 }
 0x17f   : > { %v3165_v33 = vsel %vm1356_vm12, 1.0, %v5181_v62  ;;  %v1979_v63 = vrot.slane %v1978_v10, 2  ;;  %3240 = vmatmul.mubr.msk.f32.gmra.mrb[2].mxu0 %vm2785_vm15, %v2700_v40  ;;  %v2397_v24 = vrot.slane %v2396_v54, 4  ;;  %v2753_v48 = vsel %vm2672_vm8, %v4508_v61, %v4456_v18  ;;  %v4776_v56 = vpop.permute.xlu0 %1204 }
 0x180   : > { %v1988_v9 = vrot.slane %v1987_v29, 1  ;;  %v2347_v0 = vsel %vm1639_vm11, %v3165_v33, 0.0  ;;  %v2754_v28 = vsel %vm2674_vm10, %v2297_v34, %v2753_v48  ;;  %vm1368_vm0 = vcmp.eq.s32.totalorder %v4647_v13, %v3695_v12 }
 0x181   : > { %vm1367_vm1 = vcmp.eq.s32.totalorder %v4649_v4, %v3695_v12  ;;  %v1952_v55 = vadd.f32 %v1951_v58, %v1950_v21  ;;  %v1980_v49 = vadd.f32 %v1979_v63, %v1978_v10  ;;  %v2755_v5 = vsel %vm2676_vm13, %v2304_v20, %v2754_v28 }
 0x182   : > { %v1989_v59 = vadd.f32 %v1988_v9, %v1987_v29  ;;  %v2756_v11 = vsel %vm2678_vm14, %v2311_v19, %v2755_v5  ;;  %v3177_v27 = vsel %vm1368_vm0, 1.0, %v5181_v62  ;;  %v3176_v18 = vsel %vm1367_vm1, 1.0, %v5181_v62 }
 0x183   : > { %vm1300_vm2 = vcmp.eq.s32.totalorder %v4673_v32, %v3695_v12  ;;  %v1981_v61 = vrot.slane %v1980_v49, 1  ;;  %v2398_v6 = vadd.f32 %v2397_v24, %v2396_v54  ;;  %v2348_v13 = vrot.slane %v2347_v0, 4  ;;  %3252 = vmatmul.mubr.msk.f32.gmra.mrb[2].mxu1 %vm2785_vm15, %v2756_v11  ;;  %v4799_v57 = vpop.permute.xlu0 %637 }
 0x184   : > { %v2431_v4 = vsel %vm1639_vm11, %v3177_v27, 0.0  ;;  %v2424_v25 = vsel %vm1639_vm11, %v3176_v18, 0.0  ;;  %v3109_v34 = vsel %vm1300_vm2, 1.0, %v5181_v62  ;;  %vm1293_vm3 = vcmp.eq.s32.totalorder %v4675_v8, %v3695_v12  ;;  %v4812_v18 = vpop.permute.xlu1 %770 }
 0x185   : > { %v2432_v21 = vrot.slane %v2431_v4, 4  ;;  %v1953_v32 = vrot.slane %v1952_v55, 1  ;;  %v1902_v45 = vrot.slane %v4732_v43, 2  ;;  %v1982_v35 = vadd.f32 %v1981_v61, %v1980_v49 }
 0x186   : > { %v2425_v41 = vrot.slane %v2424_v25, 4  ;;  %v1955_v3 = vsel %vm1639_vm11, %v3109_v34, 0.0  ;;  %v3102_v17 = vsel %vm1293_vm3, 1.0, %v5181_v62  ;;  %vm1311_vm4 = vcmp.eq.s32.totalorder %v4698_v38, %v3695_v12 }
 0x187   : > { %v2433_v20 = vadd.f32 %v2432_v21, %v2431_v4  ;;  %v4788_v53 = vsel %vm2666_vm9, %v1989_v59, %v1982_v35  ;;  %v2399_v19 = vrot.slane %v2398_v6, 2  ;;  %v2349_v52 = vadd.f32 %v2348_v13, %v2347_v0  ;;  %v4814_v61 = vpop.permute.xlu0 %721 }
 0x188   : > { %v2426_v47 = vadd.f32 %v2425_v41, %v2424_v25  ;;  %v1956_v50 = vrot.slane %v1955_v3, 4  ;;  %v1906_v58 = vsel %vm1639_vm11, %v3102_v17, 0.0  ;;  %v3120_v14 = vsel %vm1311_vm4, 1.0, %v5181_v62 }
 0x189   : > { %v2434_v8 = vrot.slane %v2433_v20, 2  ;;  %v4794_v60 = vsel %vm2670_vm6, %v2395_v15, %v4667_v51  ;;  %v1903_v22 = vadd.f32 %v1902_v45, %v4732_v43  ;;  %v1907_v38 = vrot.slane %v1906_v58, 4 }
 0x18a   : > { %v2427_v30 = vrot.slane %v2426_v47, 2  ;;  %v4801_v29 = vadd.f32 %v1953_v32, %v1952_v55  ;;  %v2032_v36 = vsel %vm1639_vm11, %v3120_v14, 0.0  ;;  %vm1305_vm7 = vcmp.eq.s32.totalorder %v4700_v23, %v3695_v12  ;;  %v4834_v14 = vpop.permute.xlu1 %1134 }
 0x18b   : > { %v2435_v10 = vadd.f32 %v2434_v8, %v2433_v20  ;;  %v2400_v40 = vadd.f32 %v2399_v19, %v2398_v6  ;;  %v2350_v54 = vrot.slane %v2349_v52, 2  ;;  %v2033_v15 = vrot.slane %v2032_v36, 4 }
 0x18c   : > { %v2428_v51 = vadd.f32 %v2427_v30, %v2426_v47  ;;  %v1957_v43 = vadd.f32 %v1956_v50, %v1955_v3  ;;  %v3114_v9 = vsel %vm1305_vm7, 1.0, %v5181_v62  ;;  %vm1357_vm12 = vcmp.eq.s32.totalorder %v4721_v39, %v3695_v12 }
 0x18d   : > { %v2436_v33 = vrot.slane %v2435_v10, 1  ;;  %v1904_v63 = vrot.slane %v1903_v22, 1  ;;  %v1908_v48 = vadd.f32 %v1907_v38, %v1906_v58  ;;  %v1990_v0 = vsel %vm1639_vm11, %v3114_v9, 0.0 }
 0x18e   : > { %v2429_v24 = vrot.slane %v2428_v51, 1  ;;  %v2034_v55 = vadd.f32 %v2033_v15, %v2032_v36  ;;  %v1991_v59 = vrot.slane %v1990_v0, 4  ;;  %v3166_v23 = vsel %vm1357_vm12, 1.0, %v5181_v62 }
 0x18f   : > { %v2437_v28 = vadd.f32 %v2436_v33, %v2435_v10  ;;  %v2401_v49 = vrot.slane %v2400_v40, 1  ;;  %v2351_v5 = vadd.f32 %v2350_v54, %v2349_v52  ;;  %v2354_v27 = vsel %vm1639_vm11, %v3166_v23, 0.0 }
 0x190   : > { %v2430_v11 = vadd.f32 %v2429_v24, %v2428_v51  ;;  %v1958_v39 = vrot.slane %v1957_v43, 2  ;;  %v1992_v6 = vadd.f32 %v1991_v59, %v1990_v0  ;;  %v2355_v13 = vrot.slane %v2354_v27, 4  ;;  %v1219_v59 = vpop.permute.xlu1 %1218 }
 0x191   : > { %vm1312_vm0 = vcmp.eq.s32.totalorder %v4723_v26, %v3695_v12  ;;  %v4818_v4 = vadd.f32 %v1904_v63, %v1903_v22  ;;  %v1909_v25 = vrot.slane %v1908_v48, 2  ;;  %v2035_v32 = vrot.slane %v2034_v55, 2  ;;  %v4836_v22 = vpop.permute.xlu0 %1085 }
 0x192   : > { %v4821_v21 = vsel %vm2666_vm9, %v2437_v28, %v2430_v11  ;;  %v3121_v34 = vsel %vm1312_vm0, 1.0, %v5181_v62  ;;  %v1993_v45 = vrot.slane %v1992_v6, 2  ;;  %v2356_v35 = vadd.f32 %v2355_v13, %v2354_v27 }
 0x193   : > { %v2039_v41 = vsel %vm1639_vm11, %v3121_v34, 0.0  ;;  %v4825_v20 = vadd.f32 %v2401_v49, %v2400_v40  ;;  %v2352_v3 = vrot.slane %v2351_v5, 1  ;;  %vm1369_vm1 = vcmp.eq.s32.totalorder %v4747_v2, %v3695_v12 }
 0x194   : > { %v2040_v17 = vrot.slane %v2039_v41, 4  ;;  %v1959_v26 = vadd.f32 %v1958_v39, %v1957_v43  ;;  %v1994_v19 = vadd.f32 %v1993_v45, %v1992_v6  ;;  %v3178_v52 = vsel %vm1369_vm1, 1.0, %v5181_v62 }
 0x195   : > { %vm1364_vm2 = vcmp.eq.s32.totalorder %v4749_v42, %v3695_v12  ;;  %v2357_v47 = vrot.slane %v2356_v35, 2  ;;  %v2438_v50 = vsel %vm1639_vm11, %v3178_v52, 0.0  ;;  %v1910_v30 = vadd.f32 %v1909_v25, %v1908_v48  ;;  %v4851_v23 = vpop.permute.xlu0 %1169 }
 0x196   : > { %v2041_v8 = vadd.f32 %v2040_v17, %v2039_v41  ;;  %v3173_v58 = vsel %vm1364_vm2, 1.0, %v5181_v62  ;;  %v2036_v38 = vadd.f32 %v2035_v32, %v2034_v55  ;;  %v2439_v2 = vrot.slane %v2438_v50, 4 }
 0x197   : > { %v2403_v10 = vsel %vm1639_vm11, %v3173_v58, 0.0  ;;  %vm1376_vm3 = vcmp.eq.s32.totalorder %v4774_v37, %v3695_v12  ;;  %vm1375_vm4 = vcmp.eq.s32.totalorder %v4776_v56, %v3695_v12  ;;  %v4843_v42 = vadd.f32 %v2352_v3, %v2351_v5 }
 0x198   : > { %v2042_v36 = vrot.slane %v2041_v8, 2  ;;  %v2404_v40 = vrot.slane %v2403_v10, 4  ;;  %v1995_v54 = vrot.slane %v1994_v19, 1  ;;  %v2440_v51 = vadd.f32 %v2439_v2, %v2438_v50 }
 0x199   : > { %v3185_v15 = vsel %vm1376_vm3, 1.0, %v5181_v62  ;;  %v2358_v33 = vadd.f32 %v2357_v47, %v2356_v35  ;;  %v3184_v63 = vsel %vm1375_vm4, 1.0, %v5181_v62  ;;  %v1960_v24 = vrot.slane %v1959_v26, 1  ;;  %v4874_v50 = vpop.permute.xlu0 %693 }
 0x19a   : > { %v2043_v43 = vadd.f32 %v2042_v36, %v2041_v8  ;;  %v2487_v9 = vsel %vm1639_vm11, %v3185_v15, 0.0  ;;  %v2441_v48 = vrot.slane %v2440_v51, 2  ;;  %v2405_v0 = vadd.f32 %v2404_v40, %v2403_v10  ;;  %v4872_v8 = vpop.permute.xlu1 %728 }
 0x19b   : > { %v2488_v28 = vrot.slane %v2487_v9, 4  ;;  %v1911_v37 = vrot.slane %v1910_v30, 1  ;;  %v2037_v55 = vrot.slane %v2036_v38, 1  ;;  %v2480_v56 = vsel %vm1639_vm11, %v3184_v63, 0.0 }
 0x19c   : > { %vm1301_vm7 = vcmp.eq.s32.totalorder %v4797_v46, %v3695_v12  ;;  %v1996_v49 = vadd.f32 %v1995_v54, %v1994_v19  ;;  %v2481_v11 = vrot.slane %v2480_v56, 4  ;;  %v2359_v39 = vrot.slane %v2358_v33, 1 }
 0x19d   : > { %v2489_v5 = vadd.f32 %v2488_v28, %v2487_v9  ;;  %v3110_v27 = vsel %vm1301_vm7, 1.0, %v5181_v62  ;;  %v2044_v6 = vrot.slane %v2043_v43, 1  ;;  %vm1294_vm12 = vcmp.eq.s32.totalorder %v4799_v57, %v3695_v12 }
 0x19e   : > { %v1962_v13 = vsel %vm1639_vm11, %v3110_v27, 0.0  ;;  %v2442_v25 = vadd.f32 %v2441_v48, %v2440_v51  ;;  %v2406_v34 = vrot.slane %v2405_v0, 2  ;;  %v2482_v32 = vadd.f32 %v2481_v11, %v2480_v56  ;;  %v4892_v28 = vpop.permute.xlu1 %1141 }
 0x19f   : > { %v1963_v45 = vrot.slane %v1962_v13, 4  ;;  %v4857_v46 = vadd.f32 %v1960_v24, %v1959_v26  ;;  %v4859_v35 = vadd.f32 %v1911_v37, %v1910_v30  ;;  %v3103_v41 = vsel %vm1294_vm12, 1.0, %v5181_v62  ;;  %v4894_v37 = vpop.permute.xlu0 %777 }
 0x1a0   : > { %vm1313_vm0 = vcmp.eq.s32.totalorder %v4812_v18, %v3695_v12  ;;  %v2038_v3 = vadd.f32 %v2037_v55, %v2036_v38  ;;  %v2490_v17 = vrot.slane %v2489_v5, 2  ;;  %v2483_v19 = vrot.slane %v2482_v32, 2 }
 0x1a1   : > { %v1964_v52 = vadd.f32 %v1963_v45, %v1962_v13  ;;  %v4866_v57 = vsel %vm2668_vm5, %v1996_v49, %v4788_v53  ;;  %v1913_v47 = vsel %vm1639_vm11, %v3103_v41, 0.0  ;;  %v3122_v26 = vsel %vm1313_vm0, 1.0, %v5181_v62 }
 0x1a2   : > { %vm1306_vm1 = vcmp.eq.s32.totalorder %v4814_v61, %v3695_v12  ;;  %v4876_v18 = vadd.f32 %v2359_v39, %v2358_v33  ;;  %v2045_v58 = vadd.f32 %v2044_v6, %v2043_v43  ;;  %v2443_v30 = vrot.slane %v2442_v25, 1 }
 0x1a3   : > { %v2407_v38 = vadd.f32 %v2406_v34, %v2405_v0  ;;  %v1914_v2 = vrot.slane %v1913_v47, 4  ;;  %v2046_v53 = vsel %vm1639_vm11, %v3122_v26, 0.0  ;;  %v3115_v10 = vsel %vm1306_vm1, 1.0, %v5181_v62 }
 0x1a4   : > { %vm1365_vm2 = vcmp.eq.s32.totalorder %v4834_v14, %v3695_v12  ;;  %v2491_v36 = vadd.f32 %v2490_v17, %v2489_v5  ;;  %v2484_v40 = vadd.f32 %v2483_v19, %v2482_v32  ;;  %v1965_v61 = vrot.slane %v1964_v52, 2 }
 0x1a5   : > { %v2047_v54 = vrot.slane %v2046_v53, 4  ;;  %v1915_v51 = vadd.f32 %v1914_v2, %v1913_v47  ;;  %v1997_v15 = vsel %vm1639_vm11, %v3115_v10, 0.0  ;;  %v3174_v33 = vsel %vm1365_vm2, 1.0, %v5181_v62  ;;  %v1177_v10 = vpop.permute.xlu0 %1176 }
 0x1a6   : > { %vm1358_vm3 = vcmp.eq.s32.totalorder %v4836_v22, %v3695_v12  ;;  %v4887_v43 = vsel %vm2666_vm9, %v2045_v58, %v2038_v3  ;;  %v2408_v9 = vrot.slane %v2407_v38, 1  ;;  %v1998_v24 = vrot.slane %v1997_v15, 4 }
 0x1a7   : > { %v2048_v63 = vadd.f32 %v2047_v54, %v2046_v53  ;;  %v1916_v48 = vrot.slane %v1915_v51, 2  ;;  %v2410_v14 = vsel %vm1639_vm11, %v3174_v33, 0.0  ;;  %v3167_v0 = vsel %vm1358_vm3, 1.0, %v5181_v62  ;;  %v1226_v53 = vpop.permute.xlu1 %1225 }
 0x1a8   : > { %vm1377_vm4 = vcmp.eq.s32.totalorder %v1219_v59, %v3695_v12  ;;  %v2492_v55 = vrot.slane %v2491_v36, 1  ;;  %v2485_v56 = vrot.slane %v2484_v40, 1  ;;  %v1999_v49 = vadd.f32 %v1998_v24, %v1997_v15 }
 0x1a9   : > { %v2049_v22 = vrot.slane %v2048_v63, 2  ;;  %v1966_v5 = vadd.f32 %v1965_v61, %v1964_v52  ;;  %v2411_v11 = vrot.slane %v2410_v14, 4  ;;  %v2361_v27 = vsel %vm1639_vm11, %v3167_v0, 0.0 }
 0x1aa   : > { %v3186_v39 = vsel %vm1377_vm4, 1.0, %v5181_v62  ;;  %v2000_v13 = vrot.slane %v1999_v49, 2  ;;  %v2362_v34 = vrot.slane %v2361_v27, 4  ;;  %v1917_v59 = vadd.f32 %v1916_v48, %v1915_v51 }
 0x1ab   : > { %v2050_v6 = vadd.f32 %v2049_v22, %v2048_v63  ;;  %v2494_v32 = vsel %vm1639_vm11, %v3186_v39, 0.0  ;;  %v2412_v45 = vadd.f32 %v2411_v11, %v2410_v14  ;;  %vm1370_vm7 = vcmp.eq.s32.totalorder %v4851_v23, %v3695_v12  ;;  %v785_v22 = vpop.permute.xlu1 %784 }
 0x1ac   : > { %v2495_v41 = vrot.slane %v2494_v32, 4  ;;  %v2444_v3 = vadd.f32 %v2443_v30, %v2442_v25  ;;  %v2363_v19 = vadd.f32 %v2362_v34, %v2361_v27  ;;  %v3179_v52 = vsel %vm1370_vm7, 1.0, %v5181_v62 }
 0x1ad   : > { %v2051_v17 = vrot.slane %v2050_v6, 1  ;;  %v2493_v47 = vadd.f32 %v2492_v55, %v2491_v36  ;;  %v2001_v26 = vadd.f32 %v2000_v13, %v1999_v49  ;;  %v2445_v2 = vsel %vm1639_vm11, %v3179_v52, 0.0  ;;  %v4922_v49 = vpop.permute.xlu0 %735 }
 0x1ae   : > { %v2496_v58 = vadd.f32 %v2495_v41, %v2494_v32  ;;  %v2486_v61 = vadd.f32 %v2485_v56, %v2484_v40  ;;  %v1967_v54 = vrot.slane %v1966_v5, 1  ;;  %v2364_v51 = vrot.slane %v2363_v19, 2 }
 0x1af   : > { %v2446_v15 = vrot.slane %v2445_v2, 4  ;;  %v1918_v33 = vrot.slane %v1917_v59, 1  ;;  %v2413_v63 = vrot.slane %v2412_v45, 2  ;;  %vm1307_vm12 = vcmp.eq.s32.totalorder %v4872_v8, %v3695_v12  ;;  %v1233_v52 = vpop.permute.xlu1 %1232 }
 0x1b0   : > { %vm1302_vm0 = vcmp.eq.s32.totalorder %v4874_v50, %v3695_v12  ;;  %v4909_v23 = vsel %vm2668_vm5, %v2444_v3, %v4821_v21  ;;  %v4911_v25 = vadd.f32 %v2408_v9, %v2407_v38  ;;  %v2052_v30 = vadd.f32 %v2051_v17, %v2050_v6 }
 0x1b1   : > { %v2447_v36 = vadd.f32 %v2446_v15, %v2445_v2  ;;  %v2002_v40 = vrot.slane %v2001_v26, 1  ;;  %v2497_v24 = vrot.slane %v2496_v58, 2  ;;  %v3116_v48 = vsel %vm1307_vm12, 1.0, %v5181_v62 }
 0x1b2   : > { %v3111_v14 = vsel %vm1302_vm0, 1.0, %v5181_v62  ;;  %v4916_v0 = vsel %vm2666_vm9, %v2493_v47, %v2486_v61  ;;  %v4918_v8 = vadd.f32 %v1967_v54, %v1966_v5  ;;  %v2365_v50 = vadd.f32 %v2364_v51, %v2363_v19  ;;  %v1184_v47 = vpop.permute.xlu0 %1183 }
 0x1b3   : > { %v2004_v55 = vsel %vm1639_vm11, %v3116_v48, 0.0  ;;  %v1919_v21 = vadd.f32 %v1918_v33, %v1917_v59  ;;  %v2414_v56 = vadd.f32 %v2413_v63, %v2412_v45  ;;  %v2448_v38 = vrot.slane %v2447_v36, 2 }
 0x1b4   : > { %v1969_v9 = vsel %vm1639_vm11, %v3111_v14, 0.0  ;;  %v4926_v11 = vsel %vm2668_vm5, %v2052_v30, %v4887_v43  ;;  %v2005_v27 = vrot.slane %v2004_v55, 4  ;;  %v2704_v5 = vsel %vm2672_vm8, %v4726_v7, %v4641_v1 }
 0x1b5   : > { %v1970_v39 = vrot.slane %v1969_v9, 4  ;;  %v2003_v6 = vadd.f32 %v2002_v40, %v2001_v26  ;;  %v2498_v13 = vadd.f32 %v2497_v24, %v2496_v58  ;;  %v2705_v34 = vsel %vm2674_vm10, %v4818_v4, %v2704_v5 }
 0x1b6   : > { %vm1366_vm9 = vcmp.eq.s32.totalorder %v4892_v28, %v3695_v12  ;;  %v2366_v32 = vrot.slane %v2365_v50, 1  ;;  %v2706_v43 = vsel %vm2676_vm13, %v4859_v35, %v2705_v34  ;;  %v2415_v41 = vrot.slane %v2414_v56, 1 }
 0x1b7   : > { %v1971_v59 = vadd.f32 %v1970_v39, %v1969_v9  ;;  %v3175_v45 = vsel %vm1366_vm9, 1.0, %v5181_v62  ;;  %v2449_v3 = vadd.f32 %v2448_v38, %v2447_v36  ;;  %v2707_v17 = vsel %vm2678_vm14, %v1919_v21, %v2706_v43  ;;  %v792_v9 = vpop.permute.xlu1 %791 }
 0x1b8   : > { %v2417_v1 = vsel %vm1639_vm11, %v3175_v45, 0.0  ;;  %v2006_v7 = vadd.f32 %v2005_v27, %v2004_v55  ;;  %3242 = vmatprep.mubr.msk.f32.mxu0 %vm2785_vm15, %v2707_v17  ;;  %vm1314_vm1 = vcmp.eq.s32.totalorder %v4894_v37, %v3695_v12  ;;  %v4945_v28 = vsel %vm2670_vm6, %v2003_v6, %v4866_v57  ;;  %v743_v27 = vpop.permute.xlu0 %742 }
 0x1b9   : > { %v1972_v19 = vrot.slane %v1971_v59, 2  ;;  %v2418_v4 = vrot.slane %v2417_v1, 4  ;;  %v3123_v35 = vsel %vm1314_vm1, 1.0, %v5181_v62  ;;  %vm1378_vm2 = vcmp.eq.s32.totalorder %v1226_v53, %v3695_v12 }
 0x1ba   : > { %vm1371_vm3 = vcmp.eq.s32.totalorder %v1177_v10, %v3695_v12  ;;  %v2367_v26 = vadd.f32 %v2366_v32, %v2365_v50  ;;  %v2499_v58 = vrot.slane %v2498_v13, 1  ;;  %v2053_v61 = vsel %vm1639_vm11, %v3123_v35, 0.0 }
 0x1bb   : > { %v2419_v2 = vadd.f32 %v2418_v4, %v2417_v1  ;;  %v2450_v54 = vrot.slane %v2449_v3, 1  ;;  %v2054_v51 = vrot.slane %v2053_v61, 4  ;;  %v3187_v37 = vsel %vm1378_vm2, 1.0, %v5181_v62 }
 0x1bc   : > { %v3180_v57 = vsel %vm1371_vm3, 1.0, %v5181_v62  ;;  %v2007_v15 = vrot.slane %v2006_v7, 2  ;;  %v1973_v33 = vadd.f32 %v1972_v19, %v1971_v59  ;;  %v2501_v63 = vsel %vm1639_vm11, %v3187_v37, 0.0  ;;  %v4984_v19 = vpop.permute.xlu0 %1190 }
 0x1bd   : > { %v2452_v53 = vsel %vm1639_vm11, %v3180_v57, 0.0  ;;  %v2420_v10 = vrot.slane %v2419_v2, 2  ;;  %v2055_v30 = vadd.f32 %v2054_v51, %v2053_v61  ;;  %v2502_v36 = vrot.slane %v2501_v63, 4 }
 0x1be   : > { %v2453_v40 = vrot.slane %v2452_v53, 4  ;;  %v4955_v24 = vadd.f32 %v2415_v41, %v2414_v56  ;;  %v2500_v48 = vadd.f32 %v2499_v58, %v2498_v13  ;;  %v2760_v14 = vsel %vm2672_vm8, %v4751_v44, %v4679_v16 }
 0x1bf   : > { %vm1315_vm4 = vcmp.eq.s32.totalorder %v785_v22, %v3695_v12  ;;  %v2451_v50 = vadd.f32 %v2450_v54, %v2449_v3  ;;  %v2056_v55 = vrot.slane %v2055_v30, 2  ;;  %v2503_v21 = vadd.f32 %v2502_v36, %v2501_v63 }
 0x1c0   : > { %v2761_v38 = vsel %vm2674_vm10, %v4843_v42, %v2760_v14  ;;  %v2008_v39 = vadd.f32 %v2007_v15, %v2006_v7  ;;  %v3124_v5 = vsel %vm1315_vm4, 1.0, %v5181_v62  ;;  %vm1308_vm7 = vcmp.eq.s32.totalorder %v4922_v49, %v3695_v12  ;;  %v1240_v7 = vpop.permute.xlu1 %1239  ;;  %v750_v36 = vpop.permute.xlu0 %749 }
 0x1c1   : > { %v2762_v56 = vsel %vm2676_vm13, %v4876_v18, %v2761_v38  ;;  %v1974_v16 = vrot.slane %v1973_v33, 1  ;;  %v2421_v44 = vadd.f32 %v2420_v10, %v2419_v2  ;;  %v2454_v22 = vadd.f32 %v2453_v40, %v2452_v53 }
 0x1c2   : > { %v2763_v6 = vsel %vm2678_vm14, %v2367_v26, %v2762_v56  ;;  %v4971_v13 = vsel %vm2668_vm5, %v2500_v48, %v4916_v0  ;;  %v2060_v42 = vsel %vm1639_vm11, %v3124_v5, 0.0  ;;  %v3117_v18 = vsel %vm1308_vm7, 1.0, %v5181_v62 }
 0x1c3   : > { %3254 = vmatprep.mubr.msk.f32.mxu1 %vm2785_vm15, %v2763_v6  ;;  %vm1379_vm12 = vcmp.eq.s32.totalorder %v1233_v52, %v3695_v12  ;;  %v4979_v49 = vsel %vm2670_vm6, %v2451_v50, %v4909_v23  ;;  %v2057_v34 = vadd.f32 %v2056_v55, %v2055_v30  ;;  %v2504_v32 = vrot.slane %v2503_v21, 2 }
 0x1c4   : > { %v2061_v59 = vrot.slane %v2060_v42, 4  ;;  %v2009_v43 = vrot.slane %v2008_v39, 1  ;;  %v2011_v45 = vsel %vm1639_vm11, %v3117_v18, 0.0  ;;  %v3188_v0 = vsel %vm1379_vm12, 1.0, %v5181_v62 }
 0x1c5   : > { %vm1372_vm5 = vcmp.eq.s32.totalorder %v1184_v47, %v3695_v12  ;;  %v1975_v41 = vadd.f32 %v1974_v16, %v1973_v33  ;;  %v2422_v3 = vrot.slane %v2421_v44, 1  ;;  %v2455_v17 = vrot.slane %v2454_v22, 2 }
 0x1c6   : > { %v2062_v1 = vadd.f32 %v2061_v59, %v2060_v42  ;;  %v2012_v4 = vrot.slane %v2011_v45, 4  ;;  %v2508_v23 = vsel %vm1639_vm11, %v3188_v0, 0.0  ;;  %v3181_v35 = vsel %vm1372_vm5, 1.0, %v5181_v62 }
 0x1c7   : > { %v2711_v52 = vsel %vm2672_vm8, %v4801_v29, %v4739_v31  ;;  %v2058_v26 = vrot.slane %v2057_v34, 1  ;;  %v2505_v58 = vadd.f32 %v2504_v32, %v2503_v21  ;;  %v2509_v54 = vrot.slane %v2508_v23, 4 }
 0x1c8   : > { %v2063_v2 = vrot.slane %v2062_v1, 2  ;;  %v2712_v47 = vsel %vm2674_vm10, %v4857_v46, %v2711_v52  ;;  %v2013_v61 = vadd.f32 %v2012_v4, %v2011_v45  ;;  %v2459_v51 = vsel %vm1639_vm11, %v3181_v35, 0.0  ;;  %v1198_v45 = vpop.permute.xlu0 %1197 }
 0x1c9   : > { %v2713_v37 = vsel %vm2676_vm13, %v4918_v8, %v2712_v47  ;;  %v2456_v57 = vadd.f32 %v2455_v17, %v2454_v22  ;;  %v2460_v33 = vrot.slane %v2459_v51, 4  ;;  %v2510_v31 = vadd.f32 %v2509_v54, %v2508_v23  ;;  %v799_v8 = vpop.permute.xlu1 %798 }
 0x1ca   : > { %v2064_v15 = vadd.f32 %v2063_v2, %v2062_v1  ;;  %v2714_v63 = vsel %vm2678_vm14, %v1975_v41, %v2713_v37  ;;  %v2014_v53 = vrot.slane %v2013_v61, 2  ;;  %vm1316_vm0 = vcmp.eq.s32.totalorder %v792_v9, %v3695_v12 }
 0x1cb   : > { %3243 = vmatmul.mubr.msk.f32.gmra.mrb[4].mxu0 %vm2785_vm15, %v2714_v63  ;;  %vm1309_vm9 = vcmp.eq.s32.totalorder %v743_v27, %v3695_v12  ;;  %v2423_v29 = vadd.f32 %v2422_v3, %v2421_v44  ;;  %v2461_v46 = vadd.f32 %v2460_v33, %v2459_v51  ;;  %v3125_v10 = vsel %vm1316_vm0, 1.0, %v5181_v62 }
 0x1cc   : > { %v3118_v30 = vsel %vm1309_vm9, 1.0, %v5181_v62  ;;  %v2059_v40 = vadd.f32 %v2058_v26, %v2057_v34  ;;  %v2506_v48 = vrot.slane %v2505_v58, 1  ;;  %v2067_v14 = vsel %vm1639_vm11, %v3125_v10, 0.0  ;;  %v806_v37 = vpop.permute.xlu0 %805 }
 0x1cd   : > { %v2018_v50 = vsel %vm1639_vm11, %v3118_v30, 0.0  ;;  %v2457_v55 = vrot.slane %v2456_v57, 1  ;;  %v2015_v21 = vadd.f32 %v2014_v53, %v2013_v61  ;;  %v2511_v38 = vrot.slane %v2510_v31, 2 }
 0x1ce   : > { %v2019_v9 = vrot.slane %v2018_v50, 4  ;;  %v5004_v56 = vadd.f32 %v2009_v43, %v2008_v39  ;;  %v2065_v27 = vrot.slane %v2064_v15, 1  ;;  %v2767_v5 = vsel %vm2672_vm8, %v4825_v20, %v4794_v60  ;;  %v1247_v43 = vpop.permute.xlu1 %1246 }
 0x1cf   : > { %vm1380_vm1 = vcmp.eq.s32.totalorder %v1240_v7, %v3695_v12  ;;  %v2462_v16 = vrot.slane %v2461_v46, 2  ;;  %v2068_v44 = vrot.slane %v2067_v14, 4  ;;  %v2768_v6 = vsel %vm2674_vm10, %v4911_v25, %v2767_v5 }
 0x1d0   : > { %v2020_v22 = vadd.f32 %v2019_v9, %v2018_v50  ;;  %v5014_v42 = vsel %vm2670_vm6, %v2059_v40, %v4926_v11  ;;  %v5016_v18 = vadd.f32 %v2506_v48, %v2505_v58  ;;  %v2769_v39 = vsel %vm2676_vm13, %v4955_v24, %v2768_v6 }
 0x1d1   : > { %v3189_v34 = vsel %vm1380_vm1, 1.0, %v5181_v62  ;;  %v5021_v60 = vadd.f32 %v2457_v55, %v2456_v57  ;;  %v2016_v20 = vrot.slane %v2015_v21, 1  ;;  %v2512_v32 = vadd.f32 %v2511_v38, %v2510_v31 }
 0x1d2   : > { %v2770_v59 = vsel %vm2678_vm14, %v2423_v29, %v2769_v39  ;;  %v5024_v25 = vadd.f32 %v2065_v27, %v2064_v15  ;;  %v2515_v11 = vsel %vm1639_vm11, %v3189_v34, 0.0  ;;  %vm1373_vm2 = vcmp.eq.s32.totalorder %v4984_v19, %v3695_v12  ;;  %v1254_v51 = vpop.permute.xlu1 %1253 }
 0x1d3   : > { %3255 = vmatmul.mubr.msk.f32.gmra.mrb[4].mxu1 %vm2785_vm15, %v2770_v59  ;;  %vm1317_vm3 = vcmp.eq.s32.totalorder %v799_v8, %v3695_v12  ;;  %v5031_v24 = vadd.f32 %v2462_v16, %v2461_v46  ;;  %v2069_v0 = vadd.f32 %v2068_v44, %v2067_v14  ;;  %v2021_v41 = vrot.slane %v2020_v22, 2 }
 0x1d4   : > { %v2516_v3 = vrot.slane %v2515_v11, 4  ;;  %v3182_v17 = vsel %vm1373_vm2, 1.0, %v5181_v62  ;;  %v3126_v1 = vsel %vm1317_vm3, 1.0, %v5181_v62  ;;  %vm1310_vm4 = vcmp.eq.s32.totalorder %v750_v36, %v3695_v12 }
 0x1d5   : > { %vm1381_vm7 = vcmp.eq.s32.totalorder %v1247_v43, %v3695_v12  ;;  %v2017_v7 = vadd.f32 %v2016_v20, %v2015_v21  ;;  %v2513_v4 = vrot.slane %v2512_v32, 1  ;;  %v2466_v19 = vsel %vm1639_vm11, %v3182_v17, 0.0 }
 0x1d6   : > { %v2517_v23 = vadd.f32 %v2516_v3, %v2515_v11  ;;  %v2467_v35 = vrot.slane %v2466_v19, 4  ;;  %v2074_v52 = vsel %vm1639_vm11, %v3126_v1, 0.0  ;;  %v3119_v26 = vsel %vm1310_vm4, 1.0, %v5181_v62 }
 0x1d7   : > { %v3190_v58 = vsel %vm1381_vm7, 1.0, %v5181_v62  ;;  %v2464_v2 = vrot.slane %v5031_v24, 1  ;;  %v2070_v47 = vrot.slane %v2069_v0, 2  ;;  %v2022_v61 = vadd.f32 %v2021_v41, %v2020_v22 }
 0x1d8   : > { %v2075_v54 = vrot.slane %v2074_v52, 4  ;;  %v2468_v57 = vadd.f32 %v2467_v35, %v2466_v19  ;;  %v2025_v15 = vsel %vm1639_vm11, %v3119_v26, 0.0  ;;  %v2522_v33 = vsel %vm1639_vm11, %v3190_v58, 0.0 }
 0x1d9   : > { %vm1374_vm12 = vcmp.eq.s32.totalorder %v1198_v45, %v3695_v12  ;;  %v2518_v63 = vrot.slane %v2517_v23, 2  ;;  %v2026_v31 = vrot.slane %v2025_v15, 4  ;;  %v2523_v29 = vrot.slane %v2522_v33, 4 }
 0x1da   : > { %v2076_v53 = vadd.f32 %v2075_v54, %v2074_v52  ;;  %v2469_v46 = vrot.slane %v2468_v57, 2  ;;  %v3183_v10 = vsel %vm1374_vm12, 1.0, %v5181_v62  ;;  %vm1382_vm5 = vcmp.eq.s32.totalorder %v1254_v51, %v3695_v12 }
 0x1db   : > { %vm1318_vm0 = vcmp.eq.s32.totalorder %v806_v37, %v3695_v12  ;;  %v2071_v30 = vadd.f32 %v2070_v47, %v2069_v0  ;;  %v2027_v36 = vadd.f32 %v2026_v31, %v2025_v15  ;;  %v2524_v40 = vadd.f32 %v2523_v29, %v2522_v33 }
 0x1dc   : > { %v2077_v8 = vrot.slane %v2076_v53, 2  ;;  %v2023_v48 = vrot.slane %v2022_v61, 1  ;;  %v2473_v14 = vsel %vm1639_vm11, %v3183_v10, 0.0  ;;  %v3191_v50 = vsel %vm1382_vm5, 1.0, %v5181_v62 }
 0x1dd   : > { %v3127_v55 = vsel %vm1318_vm0, 1.0, %v5181_v62  ;;  %v2519_v21 = vadd.f32 %v2518_v63, %v2517_v23  ;;  %v2470_v38 = vadd.f32 %v2469_v46, %v2468_v57  ;;  %v2028_v9 = vrot.slane %v2027_v36, 2 }
 0x1de   : > { %v2525_v27 = vrot.slane %v2524_v40, 2  ;;  %v2514_v5 = vadd.f32 %v2513_v4, %v2512_v32  ;;  %v2474_v16 = vrot.slane %v2473_v14, 4  ;;  %v2529_v44 = vsel %vm1639_vm11, %v3191_v50, 0.0 }
 0x1df   : > { %v2081_v12 = vsel %vm1639_vm11, %v3127_v55, 0.0  ;;  %v2078_v22 = vadd.f32 %v2077_v8, %v2076_v53  ;;  %v2029_v6 = vadd.f32 %v2028_v9, %v2027_v36  ;;  %v2530_v34 = vrot.slane %v2529_v44, 4 }
 0x1e0   : > { %v2526_v39 = vadd.f32 %v2525_v27, %v2524_v40  ;;  %v2072_v20 = vrot.slane %v2071_v30, 1  ;;  %v2024_v59 = vadd.f32 %v2023_v48, %v2022_v61  ;;  %v2475_v43 = vadd.f32 %v2474_v16, %v2473_v14 }
 0x1e1   : > { %v2082_v45 = vrot.slane %v2081_v12, 4  ;;  %v2520_v11 = vrot.slane %v2519_v21, 1  ;;  %v2471_v62 = vrot.slane %v2470_v38, 1  ;;  %v2030_v0 = vrot.slane %v2029_v6, 1 }
 0x1e2   : > { %v2531_v41 = vadd.f32 %v2530_v34, %v2529_v44  ;;  %v2527_v3 = vrot.slane %v2526_v39, 1  ;;  %v2476_v17 = vrot.slane %v2475_v43, 2  ;;  %v2718_v1 = vsel %vm2672_vm8, %v5004_v56, %v4945_v28 }
 0x1e3   : > { %v2083_v32 = vadd.f32 %v2082_v45, %v2081_v12  ;;  %v2079_v4 = vrot.slane %v2078_v22, 1  ;;  %v2031_v23 = vadd.f32 %v2030_v0, %v2029_v6  ;;  %v2719_v35 = vsel %vm2674_vm10, %v2017_v7, %v2718_v1 }
 0x1e4   : > { %v2532_v19 = vrot.slane %v2531_v41, 2  ;;  %v2465_v52 = vadd.f32 %v2464_v2, %v5031_v24  ;;  %v2477_v26 = vadd.f32 %v2476_v17, %v2475_v43  ;;  %v2720_v47 = vsel %vm2676_vm13, %v2024_v59, %v2719_v35 }
 0x1e5   : > { %v2084_v58 = vrot.slane %v2083_v32, 2  ;;  %v2521_v61 = vadd.f32 %v2520_v11, %v2519_v21  ;;  %v2472_v54 = vadd.f32 %v2471_v62, %v2470_v38  ;;  %v2721_v37 = vsel %vm2678_vm14, %v2031_v23, %v2720_v47 }
 0x1e6   : > { %v2533_v51 = vadd.f32 %v2532_v19, %v2531_v41  ;;  %v2073_v57 = vadd.f32 %v2072_v20, %v2071_v30  ;;  %v2528_v15 = vadd.f32 %v2527_v3, %v2526_v39  ;;  %v2478_v33 = vrot.slane %v2477_v26, 1  ;;  %3245 = vmatprep.mubr.msk.f32.mxu0 %vm2785_vm15, %v2721_v37 }
 0x1e7   : > { %v2085_v28 = vadd.f32 %v2084_v58, %v2083_v32  ;;  %v2780_v56 = vsel %vm2670_vm6, %v5016_v18, %v4971_v13  ;;  %v2080_v24 = vadd.f32 %v2079_v4, %v2078_v22  ;;  %v2774_v2 = vsel %vm2672_vm8, %v5021_v60, %v4979_v49 }
 0x1e8   : > { %v2534_v7 = vrot.slane %v2533_v51, 1  ;;  %v2479_v63 = vadd.f32 %v2478_v33, %v2477_v26  ;;  %v2775_v31 = vsel %vm2674_vm10, %v2465_v52, %v2774_v2  ;;  %v2781_v29 = vsel %vm2672_vm8, %v2514_v5, %v2780_v56 }
 0x1e9   : > { %v2086_v53 = vrot.slane %v2085_v28, 1  ;;  %v2776_v10 = vsel %vm2676_vm13, %v2472_v54, %v2775_v31  ;;  %v2725_v13 = vsel %vm2672_vm8, %v5024_v25, %v5014_v42  ;;  %v2782_v18 = vsel %vm2674_vm10, %v2521_v61, %v2781_v29 }
 0x1ea   : > { %v2535_v46 = vadd.f32 %v2534_v7, %v2533_v51  ;;  %v2777_v49 = vsel %vm2678_vm14, %v2479_v63, %v2776_v10  ;;  %v2726_v60 = vsel %vm2674_vm10, %v2073_v57, %v2725_v13  ;;  %v2783_v8 = vsel %vm2676_vm13, %v2528_v15, %v2782_v18 }
 0x1eb   : > { %v2087_v30 = vadd.f32 %v2086_v53, %v2085_v28  ;;  %3257 = vmatprep.mubr.msk.f32.mxu1 %vm2785_vm15, %v2777_v49  ;;  %v2727_v36 = vsel %vm2676_vm13, %v2080_v24, %v2726_v60 }
 0x1ec   : > { %v2784_v40 = vsel %vm2678_vm14, %v2535_v46, %v2783_v8 }
 0x1ed   : > { %v2728_v48 = vsel %vm2678_vm14, %v2087_v30, %v2727_v36  ;;  %3258 = vmatmul.mubr.msk.f32.gmra.mrb[6].mxu1 %vm2785_vm15, %v2784_v40 }
 0x1ee   : > { %3246 = vmatmul.mubr.msk.f32.gmra.mrb[6].mxu0 %vm2785_vm15, %v2728_v48 }
 0x1fd   : > { %v3238_v42 = vpop.f32.mrb[0].mxu0 }
 0x1fe   : > { %2964 = vst [vmem:[%s5086_s22 + $0x8] sm:$0xff] %v3238_v42  ;;  %v2884_v25 = vpop.f32.mrb[1].mxu0 }
 0x1ff   : > { %2963 = vst [vmem:[%s5086_s22] sm:$0xff] %v2884_v25 }
 0x204   : > { %v3250_v14 = vpop.f32.mrb[0].mxu1 }
 0x205   : > { %2972 = vst [vmem:[%s5086_s22 + $0x48] sm:$0xff] %v3250_v14  ;;  %v2924_v50 = vpop.f32.mrb[1].mxu1 }
 0x206   : > { %2971 = vst [vmem:[%s5086_s22 + $0x40] sm:$0xff] %v2924_v50 }
 0x252   : > { %v3241_v55 = vpop.f32.mrb[2].mxu0 }
 0x253   : > { %2966 = vst [vmem:[%s5086_s22 + $0x18] sm:$0xff] %v3241_v55  ;;  %v2894_v21 = vpop.f32.mrb[3].mxu0 }
 0x254   : > { %2965 = vst [vmem:[%s5086_s22 + $0x10] sm:$0xff] %v2894_v21 }
 0x256   : > { %v3253_v38 = vpop.f32.mrb[2].mxu1 }
 0x257   : > { %2974 = vst [vmem:[%s5086_s22 + $0x58] sm:$0xff] %v3253_v38  ;;  %v2934_v9 = vpop.f32.mrb[3].mxu1 }
 0x258   : > { %2973 = vst [vmem:[%s5086_s22 + $0x50] sm:$0xff] %v2934_v9 }
 0x29e   : > { %v3244_v27 = vpop.f32.mrb[4].mxu0 }
 0x29f   : > { %2968 = vst [vmem:[%s5086_s22 + $0x28] sm:$0xff] %v3244_v27  ;;  %v2904_v5 = vpop.f32.mrb[5].mxu0 }
 0x2a0   : > { %2967 = vst [vmem:[%s5086_s22 + $0x20] sm:$0xff] %v2904_v5 }
 0x2a6   : > { %v3256_v16 = vpop.f32.mrb[4].mxu1 }
 0x2a7   : > { %2976 = vst [vmem:[%s5086_s22 + $0x68] sm:$0xff] %v3256_v16  ;;  %v2944_v44 = vpop.f32.mrb[5].mxu1 }
 0x2a8   : > { %2975 = vst [vmem:[%s5086_s22 + $0x60] sm:$0xff] %v2944_v44 }
 0x2c0   : > { %v3259_v12 = vpop.f32.mrb[6].mxu1 }
 0x2c1   : > { %v3247_v22 = vpop.f32.mrb[6].mxu0  ;;  %2978 = vst [vmem:[%s5086_s22 + $0x78] sm:$0xff] %v3259_v12  ;;  %v2954_v6 = vpop.f32.mrb[7].mxu1 }
 0x2c2   : > { %2970 = vst [vmem:[%s5086_s22 + $0x38] sm:$0xff] %v3247_v22  ;;  %v2914_v39 = vpop.f32.mrb[7].mxu0  ;;  %2977 = vst [vmem:[%s5086_s22 + $0x70] sm:$0xff] %v2954_v6 }
 0x2c3   : > { %2969 = vst [vmem:[%s5086_s22 + $0x30] sm:$0xff] %v2914_v39 }
 0x2c4   : > { %3353 = shalt.err (!%p3350_p3)
}
 0x2c5   : > { %s3354_s9 = scalar_lea.hbm %s5105_s30, 2048  ;;  %s3358_s12 = scalar_lea.hbm %s5160_s4, 8192 }
 0x2c6   : > { %p3355_p4 = scmp.ne.s32.totalorder %s5105_s30, %s3354_s9  ;;  %p3359_p9 = scmp.lt.u32.totalorder %s5105_s30, %s5160_s4 }
 0x2c7   : > { %p3360_p10 = scmp.lt.u32.totalorder %s3358_s12, %s3354_s9  ;;  %p3362_p12 = scmp.lt.u32.totalorder %s3354_s9, %s5105_s30 }
 0x2c8   : > { %p3356_p7 = pnand %p3355_p4, %p3471_p5 }
 0x2c9   : > { %p3361_p11 = por %p3360_p10, %p3359_p9 }
 0x2ca   : > { %p3357_p8 = pneg %p3356_p7 }
 0x2cb   : > { %p3363_p13 = por %p3362_p12, %p3361_p11 }
 0x2cd   : > { %p3364_p0 = pnand %p3363_p13, %p3357_p8 }
 0x2cf   : > { %3367 = shalt.err (!%p3364_p0)
}
 0x2d0   : > { %s3406_s20 = smov 128   ;;  %s3407_s22 = smov 8  }
 0x2d1   : > { %3298 = dma.vmem_to_hbm [thread:$0]  (%p3471_p5), %s5107_s27, 2048, %s5105_s30, %s5115_s19, %s3406_s20, %s3406_s20, %s3407_s22  }
 0x2d2 PF: > { %p3304_p1 = scmp.ge.s32.totalorder %s3402_s18, 2  ;;  %s3008_s23 = sand.u32 1, %s3390_s15  }
 0x2d3   : > { %s3009_s28 = scalar_lea.sflag [#allocation3], %s3008_s23 }
 0x2d4   : > { %p3301_p2 = pnand %p3304_p1, %p3475_p6 }
 0x2d6   : > { %3385 = dma.done.wait (!%p3301_p2), %s3009_s28, 2048  }
 0x2d7   : > { %3387 = vsyncadd (!%p3301_p2), %s3009_s28, 4294965248  ;;  %p14_p3 = scmp.ge.s32.totalorder %s3458_s21, 6   ;;  %s5211_s15 = smov %s3394_s16 }
 0x2d8   : > { %s5212_s16 = smov %s3398_s17  ;;  %s5213_s17 = smov %s3469_s24 }
 0x2d9   : > { %s5214_s18 = smov %s3458_s21  ;;  %16 = sbr.rel (!%p14_p3) target bundleno = 3 (0x3), region = 71 }
 0x2e0   :  { %3014 = vsyncpa [#allocation3], 1 }
 0x2e1   :  { %3016 = vsyncpa [#allocation3 + $0x1], 1 }

</bundles_post_ra>
